<compile_context>
chip_gen: v5e
topology: v5e:2x2
jax: 0.10.0
libtpu: 0.0.40
codegen_flags: <defaults>
</compile_context>

<pallas_src>
import jax
import jax.numpy as jnp
import numpy as np
from jax import lax
from jax.experimental import pallas as pl
from jax.experimental.pallas import tpu as pltpu

SEX_VOCAB, AGE_VOCAB, ORIGIN_VOCAB = 2, 100, 2


def _round_up(x, m):
    return (x + m - 1) // m * m


# ---------------------------------------------------------------------------
# Fused kernel
#   feat_slab = relu([h1; h2] @ [W1_1 || W1_2] + [b1_1 || b1_2])    (one 256-wide MXU pass)
#   per bag:  gates = feat @ [Wa||Wb] + [ba||bb]
#             gated = tanh(gates[:, :D]) * sigmoid(gates[:, D:])
#             scores = wc_row @ gated^T            -> (1, N)  lane-dense
#             p = softmax(scores) (exact division)
#             M_bag = p @ feat                      (MXU)
#   M = M1 + M2 + emb[sex] + emb[age] + emb[origin]
#   logits = M @ wcls + bcls                        (wcls^T / bcls live in the vec pack)
# ---------------------------------------------------------------------------
def _make_kernel(n1, n2, l1, d, c):
    two_l1, two_d = 2 * l1, 2 * d

    def kernel(idx_ref, h_ref, w1_ref, wab_ref, vec_ref, emb_ref, out_ref):
        # ---- shared first layer: bf16 operands, f32 accumulation ----
        h = h_ref[...].astype(jnp.bfloat16)                          # (n1+n2, L0)
        feat_slab = jnp.dot(h, w1_ref[...],
                            preferred_element_type=jnp.float32)      # (n1+n2, 2*l1)
        feat_slab = jnp.maximum(feat_slab + vec_ref[0:1, 0:two_l1], 0.0)

        def bag_summary(feat, wab, bab_row, wc_row):
            # gates for both halves in one matmul (Wa||Wb fills 256 MXU lanes).
            gates = jnp.dot(feat.astype(jnp.bfloat16), wab,
                            preferred_element_type=jnp.float32) + bab_row   # (N, 2D)
            gated = jnp.tanh(gates[:, :d]) * jax.nn.sigmoid(gates[:, d:])   # (N, D) f32
            # lane-dense scores: (1, D) x (N, D)^T -> (1, N). (attention_c bias
            # is a constant shift of every score and cancels under softmax.)
            scores = lax.dot_general(wc_row, gated, (((1,), (1,)), ((), ())),
                                     preferred_element_type=jnp.float32)    # (1, N)
            scores = scores - jnp.max(scores, axis=1, keepdims=True)
            p = jnp.exp(scores)
            p = p / jnp.sum(p, axis=1, keepdims=True)                        # exact softmax
            # M_bag = p @ feat on the MXU.
            return jnp.dot(p, feat, preferred_element_type=jnp.float32)      # (1, l1)

        m1 = bag_summary(feat_slab[:n1, :l1], wab_ref[0],
                         vec_ref[1:2, 0:two_d], vec_ref[3:4, 0:d])
        m2 = bag_summary(feat_slab[n1:, l1:], wab_ref[1],
                         vec_ref[2:3, 0:two_d], vec_ref[4:5, 0:d])

        # ---- metadata embeddings: in-kernel gather from the concatenated table ----
        sex = idx_ref[0]
        age = idx_ref[1]
        origin = idx_ref[2]
        emb = (emb_ref[sex]
               + emb_ref[SEX_VOCAB + age]
               + emb_ref[SEX_VOCAB + AGE_VOCAB + origin])             # (1, l1)

        m = m1 + m2 + emb                                             # (1, l1)

        # ---- classifier: M @ wcls + bcls, with wcls^T / bcls read from the vec pack ----
        wcls_t = vec_ref[6:6 + c, 0:l1]                               # (c, l1)
        out_ref[...] = (lax.dot_general(m, wcls_t, (((1,), (1,)), ((), ())),
                                        preferred_element_type=jnp.float32)
                        + vec_ref[5:6, 0:c])                          # (1, c)

    return kernel


# ---------------------------------------------------------------------------
# Wrapper (jitted: single end-to-end dispatch; only tiny concats feed the kernel)
# ---------------------------------------------------------------------------
@jax.jit
def dual_attentions_forward(h1, h2, sex, age, origin, packed):
    n1, n2 = h1.shape[0], h2.shape[0]
    l1 = packed["w1_all"].shape[1] // 2
    d = packed["wab_all"].shape[2] // 2
    c = packed["vec"].shape[0] - 6

    idx = jnp.concatenate([sex, age, origin]).astype(jnp.int32)       # (3,)
    h_all = jnp.concatenate([h1, h2], axis=0).astype(jnp.float32)     # (n1+n2, L0)

    vmem = pl.BlockSpec(memory_space=pltpu.MemorySpace.VMEM)
    smem = pl.BlockSpec(memory_space=pltpu.MemorySpace.SMEM)

    return pl.pallas_call(
        _make_kernel(n1, n2, l1, d, c),
        out_shape=jax.ShapeDtypeStruct((1, c), jnp.float32),
        in_specs=[smem, vmem, vmem, vmem, vmem, vmem],
        out_specs=vmem,
    )(idx, h_all, packed["w1_all"], packed["wab_all"], packed["vec"],
      packed["emb_table"])


# ---------------------------------------------------------------------------
# Parameter construction.  Module init is xavier_normal weights + zero biases
# (initialize_weights) and N(0,1) embeddings; here biases are small random
# values so the test actually exercises every bias path of the kernel packing.
# ---------------------------------------------------------------------------
def _xavier_normal(key, fan_in, fan_out):
    std = float(np.sqrt(2.0 / (fan_in + fan_out)))
    return jax.random.normal(key, (fan_in, fan_out), jnp.float32) * std


def _attn_net_raw(key, L0, L1, D):
    k1, ka, kb, kc, kbias = jax.random.split(key, 5)
    kb1, kba, kbb, kbc = jax.random.split(kbias, 4)
    return {
        "w1": _xavier_normal(k1, L0, L1),
        "b1": 0.1 * jax.random.normal(kb1, (1, L1), jnp.float32),
        "wa": _xavier_normal(ka, L1, D),
        "ba": 0.1 * jax.random.normal(kba, (1, D), jnp.float32),
        "wb": _xavier_normal(kb, L1, D),
        "bb": 0.1 * jax.random.normal(kbb, (1, D), jnp.float32),
        "wc": _xavier_normal(kc, D, 1),
        "bc": 0.1 * jax.random.normal(kbc, (1, 1), jnp.float32),
    }


def pack_params(raw, L1, D, C):
    n1, n2 = raw["net1"], raw["net2"]
    # Big matmul weights -> bf16 (MXU-native, halved DMA bytes); everything else f32.
    w1_all = jnp.concatenate([n1["w1"], n2["w1"]], axis=1).astype(jnp.bfloat16)   # (L0, 2L1)
    wab_all = jnp.stack(
        [jnp.concatenate([n1["wa"], n1["wb"]], axis=1),
         jnp.concatenate([n2["wa"], n2["wb"]], axis=1)], axis=0).astype(jnp.bfloat16)  # (2, L1, 2D)

    # One lane-aligned f32 pack for every small vector (single DMA, static slices).
    W = _round_up(max(2 * L1, 2 * D), 128)
    vec = np.zeros((6 + C, W), np.float32)
    vec[0, :2 * L1] = np.concatenate([np.asarray(n1["b1"])[0], np.asarray(n2["b1"])[0]])
    vec[1, :2 * D] = np.concatenate([np.asarray(n1["ba"])[0], np.asarray(n1["bb"])[0]])
    vec[2, :2 * D] = np.concatenate([np.asarray(n2["ba"])[0], np.asarray(n2["bb"])[0]])
    vec[3, :D] = np.asarray(n1["wc"])[:, 0]
    vec[4, :D] = np.asarray(n2["wc"])[:, 0]
    vec[5, :C] = np.asarray(raw["bcls"])[0]
    vec[6:6 + C, :L1] = np.asarray(raw["wcls"]).T
    # (bc_1 / bc_2 deliberately NOT packed: constant score shifts cancel under softmax.)

    emb_table = jnp.concatenate(
        [raw["sex_emb"], raw["age_emb"], raw["origin_emb"]], axis=0)               # (104, L1)
    emb_table = emb_table.reshape(SEX_VOCAB + AGE_VOCAB + ORIGIN_VOCAB, 1, L1)     # leading-axis gather

    return {"w1_all": w1_all, "wab_all": wab_all, "vec": jnp.asarray(vec),
            "emb_table": emb_table}


def make_params(key, L0, L1, D, C):
    kn1, kn2, kcls, kbcls, ksex, kage, korg = jax.random.split(key, 7)
    raw = {
        "net1": _attn_net_raw(kn1, L0, L1, D),
        "net2": _attn_net_raw(kn2, L0, L1, D),
        "wcls": _xavier_normal(kcls, L1, C),
        "bcls": 0.1 * jax.random.normal(kbcls, (1, C), jnp.float32),
        "sex_emb": jax.random.normal(ksex, (SEX_VOCAB, L1), jnp.float32),
        "age_emb": jax.random.normal(kage, (AGE_VOCAB, L1), jnp.float32),
        "origin_emb": jax.random.normal(korg, (ORIGIN_VOCAB, L1), jnp.float32),
    }
    return pack_params(raw, L1, D, C), raw


# ---------------------------------------------------------------------------
# Pure-JAX reference (same bf16-operand / f32-accumulation choices, exact softmax,
# and it KEEPS the attention_c bias -- verifying that dropping it in the kernel
# is exactly equivalent).
# ---------------------------------------------------------------------------
def reference_forward(h1, h2, sex, age, origin, raw):
    bf16, f32 = jnp.bfloat16, jnp.float32

    def bag(h, p):
        feat = jnp.maximum(
            jnp.dot(h.astype(bf16), p["w1"].astype(bf16),
                    preferred_element_type=f32) + p["b1"], 0.0)
        fb = feat.astype(bf16)
        a = jnp.tanh(jnp.dot(fb, p["wa"].astype(bf16), preferred_element_type=f32) + p["ba"])
        b = jax.nn.sigmoid(jnp.dot(fb, p["wb"].astype(bf16), preferred_element_type=f32) + p["bb"])
        scores = jnp.dot(a * b, p["wc"], preferred_element_type=f32) + p["bc"]    # (N, 1)
        w = jax.nn.softmax(scores[:, 0])                                          # over instances
        return jnp.dot(w[None, :], feat, preferred_element_type=f32)              # (1, L1)

    m1 = bag(h1, raw["net1"])
    m2 = bag(h2, raw["net2"])
    M = (m1 + m2 + raw["sex_emb"][sex] + raw["age_emb"][age] + raw["origin_emb"][origin])
    return jnp.dot(M, raw["wcls"], preferred_element_type=f32) + raw["bcls"]


if __name__ == "__main__":
    # Small shapes consistent with the module structure (input -> hidden -> attn dim -> 1).
    L0, L1, D, C = 128, 128, 128, 2
    N1, N2 = 64, 96

    key = jax.random.PRNGKey(0)
    kp, kh1, kh2 = jax.random.split(key, 3)
    packed, raw = make_params(kp, L0, L1, D, C)

    h1 = jax.random.normal(kh1, (N1, L0), jnp.float32)
    h2 = jax.random.normal(kh2, (N2, L0), jnp.float32)
    sex = jnp.array([1], jnp.int32)
    age = jnp.array([37], jnp.int32)
    origin = jnp.array([0], jnp.int32)

    logits = jax.block_until_ready(
        dual_attentions_forward(h1, h2, sex, age, origin, packed))
    ref = reference_forward(h1, h2, sex, age, origin, raw)

    assert logits.shape == (1, C), logits.shape
    # Exact softmax division + matching bf16/f32 ops in the reference -> tight tolerance.
    # Small margin left for EUP-vs-XLA transcendental implementation differences.
    np.testing.assert_allclose(np.asarray(logits), np.asarray(ref),
                               rtol=5e-3, atol=5e-3)
    print("KERNEL_OK")
</pallas_src>

<mosaic_0001>
module attributes {stable_mosaic.version = 11 : i64} {
  func.func @kernel(%arg0: memref<3xi32, #tpu.memory_space<smem>>, %arg1: memref<160x128xf32, #tpu.memory_space<vmem>>, %arg2: memref<128x256xbf16, #tpu.memory_space<vmem>>, %arg3: memref<2x128x256xbf16, #tpu.memory_space<vmem>>, %arg4: memref<8x256xf32, #tpu.memory_space<vmem>>, %arg5: memref<104x1x128xf32, #tpu.memory_space<vmem>>, %arg6: memref<1x2xf32, #tpu.memory_space<vmem>>) attributes {dimension_semantics = [], scalar_prefetch = 0 : i64, scratch_operands = 0 : i64, tpu.core_type = #tpu.core_type<tc>} {
    %c0 = arith.constant 0 : index
    %c0_0 = arith.constant 0 : index
    %0 = vector.load %arg1[%c0, %c0_0] : memref<160x128xf32, #tpu.memory_space<vmem>>, vector<160x128xf32>
    %1 = arith.truncf %0 : vector<160x128xf32> to vector<160x128xbf16>
    %c0_1 = arith.constant 0 : index
    %c0_2 = arith.constant 0 : index
    %2 = vector.load %arg2[%c0_1, %c0_2] : memref<128x256xbf16, #tpu.memory_space<vmem>>, vector<128x256xbf16>
    %cst = arith.constant dense<0.000000e+00> : vector<160x256xf32>
    %3 = tpu.matmul %1, %2, %cst {dimension_numbers = #tpu.dot_dimension_numbers<[1], [0], [0], [1], [0, 0, 1, 1], [], []>} : vector<160x128xbf16>, vector<128x256xbf16>, vector<160x256xf32> -> vector<160x256xf32>
    %c0_3 = arith.constant 0 : index
    %c0_4 = arith.constant 0 : index
    %4 = vector.load %arg4[%c0_3, %c0_4] : memref<8x256xf32, #tpu.memory_space<vmem>>, vector<1x256xf32>
    %5 = vector.broadcast %4 : vector<1x256xf32> to vector<160x256xf32>
    %6 = arith.addf %3, %5 : vector<160x256xf32>
    %cst_5 = arith.constant 0.000000e+00 : f32
    %7 = vector.broadcast %cst_5 : f32 to vector<160x256xf32>
    %8 = arith.maximumf %6, %7 : vector<160x256xf32>
    %9 = vector.extract_strided_slice %8 {offsets = [0, 0], sizes = [64, 128], strides = [1, 1]} : vector<160x256xf32> to vector<64x128xf32>
    %c0_6 = arith.constant 0 : index
    %c0_7 = arith.constant 0 : index
    %c0_8 = arith.constant 0 : index
    %10 = vector.load %arg3[%c0_6, %c0_7, %c0_8] : memref<2x128x256xbf16, #tpu.memory_space<vmem>>, vector<1x128x256xbf16>
    %11 = vector.shape_cast %10 : vector<1x128x256xbf16> to vector<128x256xbf16>
    %c1 = arith.constant 1 : index
    %c0_9 = arith.constant 0 : index
    %12 = vector.load %arg4[%c1, %c0_9] : memref<8x256xf32, #tpu.memory_space<vmem>>, vector<1x256xf32>
    %c3 = arith.constant 3 : index
    %c0_10 = arith.constant 0 : index
    %13 = vector.load %arg4[%c3, %c0_10] : memref<8x256xf32, #tpu.memory_space<vmem>>, vector<1x128xf32>
    %14 = arith.truncf %9 : vector<64x128xf32> to vector<64x128xbf16>
    %cst_11 = arith.constant dense<0.000000e+00> : vector<64x256xf32>
    %15 = tpu.matmul %14, %11, %cst_11 {dimension_numbers = #tpu.dot_dimension_numbers<[1], [0], [0], [1], [0, 0, 1, 1], [], []>} : vector<64x128xbf16>, vector<128x256xbf16>, vector<64x256xf32> -> vector<64x256xf32>
    %16 = vector.broadcast %12 : vector<1x256xf32> to vector<64x256xf32>
    %17 = arith.addf %15, %16 : vector<64x256xf32>
    %18 = vector.extract_strided_slice %17 {offsets = [0, 0], sizes = [64, 128], strides = [1, 1]} : vector<64x256xf32> to vector<64x128xf32>
    %19 = math.tanh %18 : vector<64x128xf32>
    %20 = vector.extract_strided_slice %17 {offsets = [0, 128], sizes = [64, 128], strides = [1, 1]} : vector<64x256xf32> to vector<64x128xf32>
    %21 = arith.negf %20 : vector<64x128xf32>
    %22 = math.exp %21 : vector<64x128xf32>
    %cst_12 = arith.constant 1.000000e+00 : f32
    %23 = vector.broadcast %cst_12 : f32 to vector<64x128xf32>
    %24 = arith.addf %23, %22 : vector<64x128xf32>
    %25 = arith.divf %23, %24 : vector<64x128xf32>
    %26 = arith.mulf %19, %25 : vector<64x128xf32>
    %cst_13 = arith.constant dense<0.000000e+00> : vector<1x64xf32>
    %27 = tpu.matmul %13, %26, %cst_13 {dimension_numbers = #tpu.dot_dimension_numbers<[1], [1], [0], [0], [0, 0, 1, 0], [], []>} : vector<1x128xf32>, vector<64x128xf32>, vector<1x64xf32> -> vector<1x64xf32>
    %cst_14 = arith.constant dense<0xFF800000> : vector<1xf32>
    %28 = vector.multi_reduction <maximumf>, %27, %cst_14 [1] : vector<1x64xf32> to vector<1xf32>
    %29 = vector.shape_cast %28 : vector<1xf32> to vector<1x1xf32>
    %30 = vector.broadcast %29 : vector<1x1xf32> to vector<1x64xf32>
    %31 = arith.subf %27, %30 : vector<1x64xf32>
    %32 = math.exp %31 : vector<1x64xf32>
    %cst_15 = arith.constant dense<0.000000e+00> : vector<1xf32>
    %33 = vector.multi_reduction <add>, %32, %cst_15 [1] : vector<1x64xf32> to vector<1xf32>
    %34 = vector.shape_cast %33 : vector<1xf32> to vector<1x1xf32>
    %35 = vector.broadcast %34 : vector<1x1xf32> to vector<1x64xf32>
    %36 = arith.divf %32, %35 : vector<1x64xf32>
    %cst_16 = arith.constant dense<0.000000e+00> : vector<1x128xf32>
    %37 = tpu.matmul %36, %9, %cst_16 {dimension_numbers = #tpu.dot_dimension_numbers<[1], [0], [0], [1], [0, 0, 1, 1], [], []>} : vector<1x64xf32>, vector<64x128xf32>, vector<1x128xf32> -> vector<1x128xf32>
    %38 = vector.extract_strided_slice %8 {offsets = [64, 128], sizes = [96, 128], strides = [1, 1]} : vector<160x256xf32> to vector<96x128xf32>
    %c1_17 = arith.constant 1 : index
    %c0_18 = arith.constant 0 : index
    %c0_19 = arith.constant 0 : index
    %39 = vector.load %arg3[%c1_17, %c0_18, %c0_19] : memref<2x128x256xbf16, #tpu.memory_space<vmem>>, vector<1x128x256xbf16>
    %40 = vector.shape_cast %39 : vector<1x128x256xbf16> to vector<128x256xbf16>
    %c2 = arith.constant 2 : index
    %c0_20 = arith.constant 0 : index
    %41 = vector.load %arg4[%c2, %c0_20] : memref<8x256xf32, #tpu.memory_space<vmem>>, vector<1x256xf32>
    %c4 = arith.constant 4 : index
    %c0_21 = arith.constant 0 : index
    %42 = vector.load %arg4[%c4, %c0_21] : memref<8x256xf32, #tpu.memory_space<vmem>>, vector<1x128xf32>
    %43 = arith.truncf %38 : vector<96x128xf32> to vector<96x128xbf16>
    %cst_22 = arith.constant dense<0.000000e+00> : vector<96x256xf32>
    %44 = tpu.matmul %43, %40, %cst_22 {dimension_numbers = #tpu.dot_dimension_numbers<[1], [0], [0], [1], [0, 0, 1, 1], [], []>} : vector<96x128xbf16>, vector<128x256xbf16>, vector<96x256xf32> -> vector<96x256xf32>
    %45 = vector.broadcast %41 : vector<1x256xf32> to vector<96x256xf32>
    %46 = arith.addf %44, %45 : vector<96x256xf32>
    %47 = vector.extract_strided_slice %46 {offsets = [0, 0], sizes = [96, 128], strides = [1, 1]} : vector<96x256xf32> to vector<96x128xf32>
    %48 = math.tanh %47 : vector<96x128xf32>
    %49 = vector.extract_strided_slice %46 {offsets = [0, 128], sizes = [96, 128], strides = [1, 1]} : vector<96x256xf32> to vector<96x128xf32>
    %50 = arith.negf %49 : vector<96x128xf32>
    %51 = math.exp %50 : vector<96x128xf32>
    %cst_23 = arith.constant 1.000000e+00 : f32
    %52 = vector.broadcast %cst_23 : f32 to vector<96x128xf32>
    %53 = arith.addf %52, %51 : vector<96x128xf32>
    %54 = arith.divf %52, %53 : vector<96x128xf32>
    %55 = arith.mulf %48, %54 : vector<96x128xf32>
    %cst_24 = arith.constant dense<0.000000e+00> : vector<1x96xf32>
    %56 = tpu.matmul %42, %55, %cst_24 {dimension_numbers = #tpu.dot_dimension_numbers<[1], [1], [0], [0], [0, 0, 1, 0], [], []>} : vector<1x128xf32>, vector<96x128xf32>, vector<1x96xf32> -> vector<1x96xf32>
    %cst_25 = arith.constant dense<0xFF800000> : vector<1xf32>
    %57 = vector.multi_reduction <maximumf>, %56, %cst_25 [1] : vector<1x96xf32> to vector<1xf32>
    %58 = vector.shape_cast %57 : vector<1xf32> to vector<1x1xf32>
    %59 = vector.broadcast %58 : vector<1x1xf32> to vector<1x96xf32>
    %60 = arith.subf %56, %59 : vector<1x96xf32>
    %61 = math.exp %60 : vector<1x96xf32>
    %cst_26 = arith.constant dense<0.000000e+00> : vector<1xf32>
    %62 = vector.multi_reduction <add>, %61, %cst_26 [1] : vector<1x96xf32> to vector<1xf32>
    %63 = vector.shape_cast %62 : vector<1xf32> to vector<1x1xf32>
    %64 = vector.broadcast %63 : vector<1x1xf32> to vector<1x96xf32>
    %65 = arith.divf %61, %64 : vector<1x96xf32>
    %cst_27 = arith.constant dense<0.000000e+00> : vector<1x128xf32>
    %66 = tpu.matmul %65, %38, %cst_27 {dimension_numbers = #tpu.dot_dimension_numbers<[1], [0], [0], [1], [0, 0, 1, 1], [], []>} : vector<1x96xf32>, vector<96x128xf32>, vector<1x128xf32> -> vector<1x128xf32>
    %c0_28 = arith.constant 0 : index
    %67 = memref.load %arg0[%c0_28] : memref<3xi32, #tpu.memory_space<smem>>
    %c1_29 = arith.constant 1 : index
    %68 = memref.load %arg0[%c1_29] : memref<3xi32, #tpu.memory_space<smem>>
    %c2_30 = arith.constant 2 : index
    %69 = memref.load %arg0[%c2_30] : memref<3xi32, #tpu.memory_space<smem>>
    %70 = arith.index_cast %67 : i32 to index
    %c0_31 = arith.constant 0 : index
    %c0_32 = arith.constant 0 : index
    %71 = vector.load %arg5[%70, %c0_31, %c0_32] : memref<104x1x128xf32, #tpu.memory_space<vmem>>, vector<1x1x128xf32>
    %72 = vector.shape_cast %71 : vector<1x1x128xf32> to vector<1x128xf32>
    %c2_i32 = arith.constant 2 : i32
    %73 = arith.addi %c2_i32, %68 : i32
    %74 = arith.index_cast %73 : i32 to index
    %c0_33 = arith.constant 0 : index
    %c0_34 = arith.constant 0 : index
    %75 = vector.load %arg5[%74, %c0_33, %c0_34] : memref<104x1x128xf32, #tpu.memory_space<vmem>>, vector<1x1x128xf32>
    %76 = vector.shape_cast %75 : vector<1x1x128xf32> to vector<1x128xf32>
    %77 = arith.addf %72, %76 : vector<1x128xf32>
    %c102_i32 = arith.constant 102 : i32
    %78 = arith.addi %c102_i32, %69 : i32
    %79 = arith.index_cast %78 : i32 to index
    %c0_35 = arith.constant 0 : index
    %c0_36 = arith.constant 0 : index
    %80 = vector.load %arg5[%79, %c0_35, %c0_36] : memref<104x1x128xf32, #tpu.memory_space<vmem>>, vector<1x1x128xf32>
    %81 = vector.shape_cast %80 : vector<1x1x128xf32> to vector<1x128xf32>
    %82 = arith.addf %77, %81 : vector<1x128xf32>
    %83 = arith.addf %37, %66 : vector<1x128xf32>
    %84 = arith.addf %83, %82 : vector<1x128xf32>
    %c6 = arith.constant 6 : index
    %c0_37 = arith.constant 0 : index
    %85 = vector.load %arg4[%c6, %c0_37] : memref<8x256xf32, #tpu.memory_space<vmem>>, vector<2x128xf32>
    %cst_38 = arith.constant dense<0.000000e+00> : vector<1x2xf32>
    %86 = tpu.matmul %84, %85, %cst_38 {dimension_numbers = #tpu.dot_dimension_numbers<[1], [1], [0], [0], [0, 0, 1, 0], [], []>} : vector<1x128xf32>, vector<2x128xf32>, vector<1x2xf32> -> vector<1x2xf32>
    %c5 = arith.constant 5 : index
    %c0_39 = arith.constant 0 : index
    %87 = vector.load %arg4[%c5, %c0_39] : memref<8x256xf32, #tpu.memory_space<vmem>>, vector<1x2xf32>
    %88 = arith.addf %86, %87 : vector<1x2xf32>
    %c0_40 = arith.constant 0 : index
    %c0_41 = arith.constant 0 : index
    %89 = vector.load %arg6[%c0_40, %c0_41] : memref<1x2xf32, #tpu.memory_space<vmem>>, vector<1x2xf32>
    tpu.vector_store %arg6[%c0_40, %c0_41], %88 {strides = array<i32>} : memref<1x2xf32, #tpu.memory_space<vmem>>, vector<1x2xf32>,
    return
  }
}

</mosaic_0001>

<bundles_post_ra>
// kernel: dual_attentions_forward.1
= control target key start
LH: loop header
LB: loop body
LE: loop exit
PB: predicated region body
PF: predicated region fallthrough
CT: control target
= control target key end

     0   :  { %11 = vsyncpa [#allocation5], 0  ;;  %s2597_s0 = inlined_call_operand.vmem [shape: s32[3], index: 0, kind: input, shape index: {}]   ;;  %s2598_s1 = inlined_call_operand.vmem [shape: f32[160,128], index: 1, kind: input, shape index: {}]   ;;  %s2599_s2 = inlined_call_operand.hbm [shape: bf16[128,256], index: 2, kind: input, shape index: {}]   ;;  %s2600_s3 = inlined_call_operand.vmem [shape: bf16[2,128,256], index: 3, kind: input, shape index: {}]   ;;  %s2601_s4 = inlined_call_operand.vmem [shape: f32[8,256], index: 4, kind: input, shape index: {}]   ;;  %s2602_s5 = inlined_call_operand.hbm [shape: f32[104,1,128], index: 5, kind: input, shape index: {}]   ;;  %s2603_s6 = inlined_call_operand.hbm [shape: f32[1,2], index: 6, kind: output, shape index: {}]  }
   0x1   :  { %12 = vsyncpa [#allocation3], 0 }
   0x2   :  { %13 = vsyncpa [#allocation8], 0 }
   0x3   :  { %14 = vsyncpa [#allocation4], 0  ;;  %s20_s23 = sshll.u32 %s2597_s0, 4  ;;  %s30_s26 = sshll.u32 %s2599_s2, 4  ;;  %s21_s23 = int_to_ptr.vmem [resolvable:$true] %s20_s23  ;;  %s31_s26 = int_to_ptr.hbm [resolvable:$true] %s30_s26 }
   0x4   :  { %s1809_s27 = smov [#allocation2]   ;;  %s1810_s28 = smov [#allocation6]  }
   0x5   :  { %23 = dma.vmem_to_smem %s21_s23, 16, %s1809_s27, [#allocation5]  }
   0x6   :  { %s32_s29 = sshll.u32 %s1810_s28, 4  ;;  %s1811_s30 = smov 128   ;;  %s33_s29 = int_to_ptr.vmem [resolvable:$true] %s32_s29 }
   0x7   :  { %s1812_s7 = smov 8   ;;  %s47_s10 = sshll.u32 %s2602_s5, 4  ;;  %s48_s10 = int_to_ptr.hbm [resolvable:$true] %s47_s10 }
   0x8   :  { %38 = dma.hbm_to_vmem [thread:$0]  %s31_s26, 2048, %s33_s29, [#allocation3], %s1811_s30, %s1811_s30, %s1812_s7  }
   0x9   :  { %s1813_s0 = smov [#allocation7]   ;;  %s1814_s12 = smov 16  }
   0xa   :  { %s49_s11 = sshll.u32 %s1813_s0, 4  ;;  %s1815_s13 = smov 1   ;;  %s50_s11 = int_to_ptr.vmem [resolvable:$true] %s49_s11 }
   0xb   :  { %55 = dma.hbm_to_vmem [thread:$0]  %s48_s10, 1664, %s50_s11, [#allocation8], %s1814_s12, %s1814_s12, %s1815_s13  }
   0xc   :  { %1801 = dma.done.wait [#allocation5], 16  }
   0xd   :  { %1802 = vsyncadd [#allocation5], 4294967280 }
   0xe   :  { %1803 = dma.done.wait [#allocation3], 2048  }
   0xf   :  { %1804 = vsyncadd [#allocation3], 4294965248 }
  0x10   :  { %1805 = dma.done.wait [#allocation8], 1664  }
  0x11   :  { %1806 = vsyncadd [#allocation8], 4294965632 }
  0x12   :  { %68 = sfence }
  0x13   :  { %v1355_v0 = vld [vmem:[#allocation6 + $0x70] sm:$0xf]  ;;  %v1548_v1 = vld [vmem:[#allocation6 + $0x74] sm:$0xf0]  ;;  %v1347_v2 = vld [vmem:[#allocation6 + $0x60] sm:$0xf] }
  0x14   :  { %v1356_v3 = vor.u32 %v1548_v1, %v1355_v0  ;;  %v1546_v4 = vld [vmem:[#allocation6 + $0x64] sm:$0xf0]  ;;  %v1339_v6 = vld [vmem:[#allocation6 + $0x50] sm:$0xf]  ;;  %v1544_v7 = vld [vmem:[#allocation6 + $0x54] sm:$0xf0] }
  0x15   :  { %v1348_v5 = vor.u32 %v1546_v4, %v1347_v2  ;;  %v1340_v8 = vor.u32 %v1544_v7, %v1339_v6  ;;  %v1331_v9 = vld [vmem:[#allocation6 + $0x40] sm:$0xf]  ;;  %v1542_v10 = vld [vmem:[#allocation6 + $0x44] sm:$0xf0]  ;;  %v1323_v12 = vld [vmem:[#allocation6 + $0x30] sm:$0xf] }
  0x16   :  { %201 = vmatpush.bf16.msra.mxu0 %v1356_v3  ;;  %v1332_v11 = vor.u32 %v1542_v10, %v1331_v9  ;;  %v1540_v13 = vld [vmem:[#allocation6 + $0x34] sm:$0xf0]  ;;  %v1315_v15 = vld [vmem:[#allocation6 + $0x20] sm:$0xf]  ;;  %v1538_v16 = vld [vmem:[#allocation6 + $0x24] sm:$0xf0] }
  0x17   :  { %v1324_v14 = vor.u32 %v1540_v13, %v1323_v12  ;;  %v1316_v17 = vor.u32 %v1538_v16, %v1315_v15  ;;  %v1307_v18 = vld [vmem:[#allocation6 + $0x10] sm:$0xf]  ;;  %v1536_v19 = vld [vmem:[#allocation6 + $0x14] sm:$0xf0]  ;;  %v1299_v21 = vld [vmem:[#allocation6] sm:$0xf] }
  0x18   :  { %v1308_v20 = vor.u32 %v1536_v19, %v1307_v18  ;;  %v1534_v22 = vld [vmem:[#allocation6 + $0x4] sm:$0xf0]  ;;  %v69_v24 = vld [vmem:[%s2598_s1] sm:$0xff]  ;;  %v71_v27 = vld [vmem:[%s2598_s1 + $0x10] sm:$0xff]  ;;  %s1208_s27 = sld [smem:[#allocation2]]  ;;  %s1816_s0 = smov [#allocation9]  }
  0x19   :  { %v1300_v23 = vor.u32 %v1534_v22, %v1299_v21  ;;  %v70_v25 = vld [vmem:[%s2598_s1 + $0x8] sm:$0xff]  ;;  %v72_v28 = vld [vmem:[%s2598_s1 + $0x18] sm:$0xff]  ;;  %v1547_v30 = vld [vmem:[#allocation6 + $0x74] sm:$0xf]  ;;  %s1528_s28 = sld [smem:[#allocation2 + $0x1]]  ;;  %s1278_s11 = sshll.u32 %s1816_s0, 4  ;;  %s1279_s11 = int_to_ptr.vmem [resolvable:$true] %s1278_s11 }
  0x1a   :  { %202 = vmatpush.bf16.msra.mxu0 %v1348_v5  ;;  %v1867_v26 = vpack.c.bf16 %v70_v25, %v69_v24  ;;  %v1876_v29 = vpack.c.bf16 %v72_v28, %v71_v27  ;;  %v1357_v31 = vld [vmem:[#allocation6 + $0x78] sm:$0xf0]  ;;  %v1545_v32 = vld [vmem:[#allocation6 + $0x64] sm:$0xf]  ;;  %v1349_v34 = vld [vmem:[#allocation6 + $0x68] sm:$0xf0] }
  0x1b   :  { %v1360_v33 = vor.u32 %v1547_v30, %v1357_v31  ;;  %v1352_v35 = vor.u32 %v1545_v32, %v1349_v34  ;;  %v1543_v36 = vld [vmem:[#allocation6 + $0x54] sm:$0xf]  ;;  %v1341_v37 = vld [vmem:[#allocation6 + $0x58] sm:$0xf0]  ;;  %v1420_v38 = vld [vmem:[%s2600_s3 + $0x70] sm:$0xf] }
  0x1c   :  { %v1564_v39 = vld [vmem:[%s2600_s3 + $0x74] sm:$0xf0]  ;;  %v1563_v41 = vld [vmem:[%s2600_s3 + $0x74] sm:$0xf]  ;;  %v1422_v42 = vld [vmem:[%s2600_s3 + $0x78] sm:$0xf0]  ;;  %v1344_v44 = vor.u32 %v1543_v36, %v1341_v37 }
  0x1d   :  { %248 = vmatpush.bf16.msra.mxu1 %v1360_v33  ;;  %v1421_v40 = vor.u32 %v1564_v39, %v1420_v38  ;;  %v1412_v43 = vld [vmem:[%s2600_s3 + $0x60] sm:$0xf]  ;;  %v1425_v45 = vor.u32 %v1563_v41, %v1422_v42  ;;  %v1562_v46 = vld [vmem:[%s2600_s3 + $0x64] sm:$0xf0]  ;;  %v1561_v47 = vld [vmem:[%s2600_s3 + $0x64] sm:$0xf] }
  0x1e   :  { %203 = vmatpush.bf16.msra.mxu0 %v1340_v8  ;;  %v1414_v48 = vld [vmem:[%s2600_s3 + $0x68] sm:$0xf0]  ;;  %v73_v49 = vld [vmem:[%s2598_s1 + $0x20] sm:$0xff]  ;;  %v1413_v52 = vor.u32 %v1562_v46, %v1412_v43  ;;  %v1404_v55 = vld [vmem:[%s2600_s3 + $0x50] sm:$0xf]  ;;  %s1529_s29 = sld [smem:[#allocation2 + $0x2]] }
  0x1f   :  { %v1541_v50 = vld [vmem:[#allocation6 + $0x44] sm:$0xf]  ;;  %v1333_v51 = vld [vmem:[#allocation6 + $0x48] sm:$0xf0]  ;;  %427 = vmatpush.bf16.msra.mxu2 %v1421_v40  ;;  %456 = vmatpush.bf16.msra.mxu3 %v1425_v45  ;;  %v1417_v54 = vor.u32 %v1561_v47, %v1414_v48  ;;  %v1560_v56 = vld [vmem:[%s2600_s3 + $0x54] sm:$0xf0] }
  0x20   :  { %v74_v53 = vld [vmem:[%s2598_s1 + $0x28] sm:$0xff]  ;;  %v1559_v57 = vld [vmem:[%s2600_s3 + $0x54] sm:$0xf]  ;;  %v1406_v58 = vld [vmem:[%s2600_s3 + $0x58] sm:$0xf0]  ;;  %v1336_v59 = vor.u32 %v1541_v50, %v1333_v51  ;;  %v1405_v63 = vor.u32 %v1560_v56, %v1404_v55  ;;  %s1211_s30 = scalar_lea.vmem [#allocation7], %s1208_s27 }
  0x21   :  { %249 = vmatpush.bf16.msra.mxu1 %v1352_v35  ;;  %v91_v60 = vpack.c.bf16 %v74_v53, %v73_v49  ;;  %v1539_v61 = vld [vmem:[#allocation6 + $0x34] sm:$0xf]  ;;  %v1325_v62 = vld [vmem:[#allocation6 + $0x38] sm:$0xf0]  ;;  %v1409_v0 = vor.u32 %v1559_v57, %v1406_v58  ;;  %v1396_v1 = vld [vmem:[%s2600_s3 + $0x40] sm:$0xf] }
  0x22   :  { %204 = vmatpush.bf16.msra.mxu0 %v1332_v11  ;;  %v1558_v2 = vld [vmem:[%s2600_s3 + $0x44] sm:$0xf0]  ;;  %v1557_v3 = vld [vmem:[%s2600_s3 + $0x44] sm:$0xf]  ;;  %v1398_v4 = vld [vmem:[%s2600_s3 + $0x48] sm:$0xf0]  ;;  %v1328_v5 = vor.u32 %v1539_v61, %v1325_v62 }
  0x23   :  { %428 = vmatpush.bf16.msra.mxu2 %v1413_v52  ;;  %457 = vmatpush.bf16.msra.mxu3 %v1417_v54  ;;  %v1537_v6 = vld [vmem:[#allocation6 + $0x24] sm:$0xf]  ;;  %v1317_v7 = vld [vmem:[#allocation6 + $0x28] sm:$0xf0]  ;;  %v1397_v8 = vor.u32 %v1558_v2, %v1396_v1  ;;  %v1401_v9 = vor.u32 %v1557_v3, %v1398_v4  ;;  %v1535_v11 = vld [vmem:[#allocation6 + $0x14] sm:$0xf] }
  0x24   :  { %v1320_v10 = vor.u32 %v1537_v6, %v1317_v7  ;;  %v1309_v12 = vld [vmem:[#allocation6 + $0x18] sm:$0xf0]  ;;  %v1301_v15 = vld [vmem:[#allocation6 + $0x8] sm:$0xf0]  ;;  %v75_v16 = vld [vmem:[%s2598_s1 + $0x30] sm:$0xff]  ;;  %s1293_s7 = scalar_lea.vmem [#allocation7], %s1528_s28 }
  0x25   :  { %250 = vmatpush.bf16.msra.mxu1 %v1344_v44  ;;  %v1312_v13 = vor.u32 %v1535_v11, %v1309_v12  ;;  %v1556_v21 = vld [vmem:[%s2600_s3 + $0x34] sm:$0xf0]  ;;  %v1555_v22 = vld [vmem:[%s2600_s3 + $0x34] sm:$0xf]  ;;  %v1390_v24 = vld [vmem:[%s2600_s3 + $0x38] sm:$0xf0] }
  0x26   :  { %205 = vmatpush.bf16.msra.mxu0 %v1324_v14  ;;  %v1533_v14 = vld [vmem:[#allocation6 + $0x4] sm:$0xf]  ;;  %v1393_v25 = vor.u32 %v1555_v22, %v1390_v24  ;;  %v1554_v27 = vld [vmem:[%s2600_s3 + $0x24] sm:$0xf0]  ;;  %v1382_v30 = vld [vmem:[%s2600_s3 + $0x28] sm:$0xf0] }
  0x27   :  { %429 = vmatpush.bf16.msra.mxu2 %v1405_v63  ;;  %458 = vmatpush.bf16.msra.mxu3 %v1409_v0  ;;  %v1304_v18 = vor.u32 %v1533_v14, %v1301_v15  ;;  %v1553_v28 = vld [vmem:[%s2600_s3 + $0x24] sm:$0xf]  ;;  %v1372_v32 = vld [vmem:[%s2600_s3 + $0x10] sm:$0xf]  ;;  %v1552_v33 = vld [vmem:[%s2600_s3 + $0x14] sm:$0xf0] }
  0x28   :  { %v1385_v31 = vor.u32 %v1553_v28, %v1382_v30  ;;  %v1551_v34 = vld [vmem:[%s2600_s3 + $0x14] sm:$0xf]  ;;  %v1373_v35 = vor.u32 %v1552_v33, %v1372_v32  ;;  %v1374_v36 = vld [vmem:[%s2600_s3 + $0x18] sm:$0xf0]  ;;  %v1364_v38 = vld [vmem:[%s2600_s3] sm:$0xf] }
  0x29   :  { %251 = vmatpush.bf16.msra.mxu1 %v1336_v59  ;;  %v1377_v37 = vor.u32 %v1551_v34, %v1374_v36  ;;  %v1550_v39 = vld [vmem:[%s2600_s3 + $0x4] sm:$0xf0]  ;;  %v1549_v40 = vld [vmem:[%s2600_s3 + $0x4] sm:$0xf]  ;;  %v1366_v42 = vld [vmem:[%s2600_s3 + $0x8] sm:$0xf0] }
  0x2a   :  { %206 = vmatpush.bf16.msra.mxu0 %v1316_v17  ;;  %v76_v17 = vld [vmem:[%s2598_s1 + $0x38] sm:$0xff]  ;;  %v1365_v41 = vor.u32 %v1550_v39, %v1364_v38  ;;  %v1369_v43 = vor.u32 %v1549_v40, %v1366_v42  ;;  %v1509_v44 = vld [vmem:[%s2600_s3 + $0xf0] sm:$0xf]  ;;  %v1998_v47 = vld [vmem:[%s2601_s4] ss:$8 sm:$0x3] }
  0x2b   :  { %430 = vmatpush.bf16.msra.mxu2 %v1397_v8  ;;  %459 = vmatpush.bf16.msra.mxu3 %v1401_v9  ;;  %v92_v19 = vpack.c.bf16 %v76_v17, %v75_v16  ;;  %v1580_v45 = vld [vmem:[%s2600_s3 + $0xf4] sm:$0xf0]  ;;  %v1501_v49 = vld [vmem:[%s2600_s3 + $0xe0] sm:$0xf]  ;;  %v1578_v50 = vld [vmem:[%s2600_s3 + $0xe4] sm:$0xf0] }
  0x2c   :  { %v1510_v46 = vor.u32 %v1580_v45, %v1509_v44  ;;  %v1502_v51 = vor.u32 %v1578_v50, %v1501_v49  ;;  %v2007_v52 = vperm.slane %v1998_v47, 0  ;;  %v1493_v53 = vld [vmem:[%s2600_s3 + $0xd0] sm:$0xf]  ;;  %v1576_v54 = vld [vmem:[%s2600_s3 + $0xd4] sm:$0xf0]  ;;  %v77_v62 = vld [vmem:[%s2598_s1 + $0x40] sm:$0xff] }
  0x2d   :  { %252 = vmatpush.bf16.msra.mxu1 %v1328_v5  ;;  %v1494_v55 = vor.u32 %v1576_v54, %v1493_v53  ;;  %v1485_v59 = vld [vmem:[%s2600_s3 + $0xc0] sm:$0xf]  ;;  %v78_v63 = vld [vmem:[%s2598_s1 + $0x48] sm:$0xff]  ;;  %v1477_v4 = vld [vmem:[%s2600_s3 + $0xb0] sm:$0xf]  ;;  %s1295_s8 = scalar_lea.vmem [#allocation7], %s1529_s29 }
  0x2e   :  { %207 = vmatpush.bf16.msra.mxu0 %v1308_v20  ;;  %v1388_v20 = vld [vmem:[%s2600_s3 + $0x30] sm:$0xf]  ;;  %v93_v2 = vpack.c.bf16 %v78_v63, %v77_v62  ;;  %v1572_v5 = vld [vmem:[%s2600_s3 + $0xb4] sm:$0xf0]  ;;  %v1469_v8 = vld [vmem:[%s2600_s3 + $0xa0] sm:$0xf] }
  0x2f   :  { %460 = vmatpush.bf16.msra.mxu3 %v1393_v25  ;;  %v1478_v6 = vor.u32 %v1572_v5, %v1477_v4  ;;  %v1570_v9 = vld [vmem:[%s2600_s3 + $0xa4] sm:$0xf0]  ;;  %v1461_v11 = vld [vmem:[%s2600_s3 + $0x90] sm:$0xf]  ;;  %v1568_v12 = vld [vmem:[%s2600_s3 + $0x94] sm:$0xf0] }
  0x30   :  { %v1453_v17 = vld [vmem:[%s2600_s3 + $0x80] sm:$0xf]  ;;  %v82_v33 = vld [vmem:[%s2598_s1 + $0x68] sm:$0xff]  ;;  %v83_v39 = vld [vmem:[%s2598_s1 + $0x70] sm:$0xff]  ;;  %s1280_s2 = sshll.u32 %s2603_s6, 4  ;;  %s1281_s2 = int_to_ptr.hbm [resolvable:$true] %s1280_s2 }
  0x31   :  { %253 = vmatpush.bf16.msra.mxu1 %v1320_v10  ;;  %v1470_v10 = vor.u32 %v1570_v9, %v1469_v8  ;;  %v81_v32 = vld [vmem:[%s2598_s1 + $0x60] sm:$0xff]  ;;  %v84_v40 = vld [vmem:[%s2598_s1 + $0x78] sm:$0xff] }
  0x32   :  { %208 = vmatpush.bf16.msra.mxu0 %v1300_v23  ;;  %v1389_v23 = vor.u32 %v1556_v21, %v1388_v20  ;;  %v79_v20 = vld [vmem:[%s2598_s1 + $0x50] sm:$0xff]  ;;  %v80_v21 = vld [vmem:[%s2598_s1 + $0x58] sm:$0xff]  ;;  %v95_v34 = vpack.c.bf16 %v82_v33, %v81_v32  ;;  %v85_v50 = vld [vmem:[%s2598_s1 + $0x80] sm:$0xff] }
  0x33   :  { %461 = vmatpush.bf16.msra.mxu3 %v1385_v31  ;;  %v94_v24 = vpack.c.bf16 %v80_v21, %v79_v20  ;;  %v1361_v63 = vld [vmem:[%s2601_s4 + $0x1] ss:$8 sm:$0x3] }
  0x34   :  { %431 = vmatpush.bf16.msra.mxu2 %v1389_v23  ;;  %v2130_v21 = vperm.slane %v1361_v63, 0 }
  0x35   :  { %209 = vmatmul.bf16.vlgmr.msra.gmra.mxu0 %v1867_v26  ;;  %254 = vmatpush.bf16.msra.mxu1 %v1312_v13  ;;  %v1462_v13 = vor.u32 %v1568_v12, %v1461_v11 }
  0x37   :  { %462 = vmatpush.bf16.msra.mxu3 %v1377_v37 }
  0x39   :  { %255 = vmatpush.bf16.msra.mxu1 %v1304_v18  ;;  %v1566_v18 = vld [vmem:[%s2600_s3 + $0x84] sm:$0xf0] }
  0x3b   :  { %463 = vmatpush.bf16.msra.mxu3 %v1369_v43  ;;  %v96_v43 = vpack.c.bf16 %v84_v40, %v83_v39 }
  0x3c   :  { %256 = vmatmul.bf16.vlgmr.msra.gmra.mxu1 %v1867_v26  ;;  %v1380_v26 = vld [vmem:[%s2600_s3 + $0x20] sm:$0xf] }
  0x3f   :  { %809 = vmatpush.bf16.msrb.mxu3 %v1510_v46 }
  0x43   :  { %810 = vmatpush.bf16.msrb.mxu3 %v1502_v51  ;;  %v86_v51 = vld [vmem:[%s2598_s1 + $0x88] sm:$0xff] }
  0x45   :  { %214 = vmatmul.bf16.gmra.mxu0 %v1876_v29 }
  0x47   :  { %811 = vmatpush.bf16.msrb.mxu3 %v1494_v55  ;;  %v87_v55 = vld [vmem:[%s2598_s1 + $0x90] sm:$0xff] }
  0x4c   :  { %259 = vmatmul.bf16.gmra.mxu1 %v1876_v29  ;;  %v1381_v29 = vor.u32 %v1554_v27, %v1380_v26 }
  0x4e   :  { %432 = vmatpush.bf16.msra.mxu2 %v1381_v29 }
  0x52   :  { %433 = vmatpush.bf16.msra.mxu2 %v1373_v35 }
  0x55   :  { %219 = vmatmul.bf16.gmra.mxu0 %v91_v60 }
  0x56   :  { %434 = vmatpush.bf16.msra.mxu2 %v1365_v41 }
  0x5c   :  { %262 = vmatmul.bf16.gmra.mxu1 %v91_v60  ;;  %v1574_v60 = vld [vmem:[%s2600_s3 + $0xc4] sm:$0xf0] }
  0x5d   :  { %v1486_v61 = vor.u32 %v1574_v60, %v1485_v59 }
  0x5f   :  { %812 = vmatpush.bf16.msrb.mxu3 %v1486_v61 }
  0x63   :  { %813 = vmatpush.bf16.msrb.mxu3 %v1478_v6 }
  0x65   :  { %224 = vmatmul.bf16.gmra.mxu0 %v92_v19 }
  0x67   :  { %814 = vmatpush.bf16.msrb.mxu3 %v1470_v10 }
  0x6b   :  { %815 = vmatpush.bf16.msrb.mxu3 %v1462_v13 }
  0x6c   :  { %265 = vmatmul.bf16.gmra.mxu1 %v92_v19  ;;  %v1454_v19 = vor.u32 %v1566_v18, %v1453_v17 }
  0x6f   :  { %816 = vmatpush.bf16.msrb.mxu3 %v1454_v19 }
  0x75   :  { %229 = vmatmul.bf16.gmra.mxu0 %v93_v2 }
  0x7c   :  { %268 = vmatmul.bf16.gmra.mxu1 %v93_v2 }
  0x85   :  { %232 = vmatmul.bf16.gmra.mxu0 %v94_v24 }
  0x8c   :  { %273 = vmatmul.bf16.gmra.mxu1 %v94_v24 }
  0x95   :  { %235 = vmatmul.bf16.gmra.mxu0 %v95_v34 }
  0x9c   :  { %278 = vmatmul.bf16.gmra.mxu1 %v95_v34 }
  0xa5   :  { %238 = vmatmul.bf16.gmra.mxu0 %v96_v43 }
  0xac   :  { %283 = vmatmul.bf16.gmra.mxu1 %v96_v43 }
  0xb2   :  { %v210_v48 = vpop.f32.mrf.mxu0 }
  0xb3   :  { %v2016_v56 = vadd.f32 %v210_v48, %v2007_v52 }
  0xb5   :  { %v299_v0 = vmax.f32 %v2016_v56, 0.0 }
  0xb9   :  { %v257_v37 = vpop.f32.mrf.mxu1 }
  0xba   :  { %v212_v57 = vpop.f32.mrf.mxu0 }
  0xbb   :  { %v2019_v58 = vadd.f32 %v212_v57, %v2007_v52  ;;  %v88_v57 = vld [vmem:[%s2598_s1 + $0x98] sm:$0xff] }
  0xbc   :  { %v98_v59 = vpack.c.bf16 %v88_v57, %v87_v55 }
  0xbd   :  { %v300_v1 = vmax.f32 %v2019_v58, 0.0 }
  0xbf   :  { %v338_v3 = vpack.c.bf16 %v300_v1, %v299_v0 }
  0xc1   :  { %435 = vmatmul.bf16.vlgmr.msra.gmra.mxu2 %v338_v3  ;;  %464 = vmatmul.bf16.vlgmr.msra.gmra.mxu3 %v338_v3  ;;  %v258_v44 = vpop.f32.mrf.mxu1 }
  0xc2   :  { %v215_v7 = vpop.f32.mrf.mxu0 }
  0xc3   :  { %v216_v14 = vadd.f32 %v215_v7, %v2007_v52 }
  0xc5   :  { %v301_v22 = vmax.f32 %v216_v14, 0.0 }
  0xc9   :  { %v260_v49 = vpop.f32.mrf.mxu1 }
  0xca   :  { %v217_v15 = vpop.f32.mrf.mxu0 }
  0xcb   :  { %v218_v16 = vadd.f32 %v217_v15, %v2007_v52 }
  0xcd   :  { %v302_v23 = vmax.f32 %v218_v16, 0.0 }
  0xcf   :  { %v339_v25 = vpack.c.bf16 %v302_v23, %v301_v22 }
  0xd1   :  { %440 = vmatmul.bf16.gmra.mxu2 %v339_v25  ;;  %469 = vmatmul.bf16.gmra.mxu3 %v339_v25  ;;  %v261_v53 = vpop.f32.mrf.mxu1 }
  0xd2   :  { %v220_v26 = vpop.f32.mrf.mxu0 }
  0xd3   :  { %v221_v27 = vadd.f32 %v220_v26, %v2007_v52 }
  0xd5   :  { %v303_v30 = vmax.f32 %v221_v27, 0.0 }
  0xd9   :  { %v263_v54 = vpop.f32.mrf.mxu1 }
  0xda   :  { %v222_v28 = vpop.f32.mrf.mxu0 }
  0xdb   :  { %v223_v29 = vadd.f32 %v222_v28, %v2007_v52 }
  0xdd   :  { %v304_v31 = vmax.f32 %v223_v29, 0.0 }
  0xdf   :  { %v340_v35 = vpack.c.bf16 %v304_v31, %v303_v30 }
  0xe1   :  { %445 = vmatmul.bf16.gmra.mxu2 %v340_v35  ;;  %474 = vmatmul.bf16.gmra.mxu3 %v340_v35  ;;  %v264_v60 = vpop.f32.mrf.mxu1 }
  0xe2   :  { %v225_v36 = vpop.f32.mrf.mxu0 }
  0xe3   :  { %v226_v38 = vadd.f32 %v225_v36, %v2007_v52 }
  0xe5   :  { %v305_v45 = vmax.f32 %v226_v38, 0.0 }
  0xe9   :  { %v266_v58 = vpop.f32.mrf.mxu1 }
  0xea   :  { %v227_v41 = vpop.f32.mrf.mxu0 }
  0xeb   :  { %v228_v42 = vadd.f32 %v227_v41, %v2007_v52  ;;  %v97_v52 = vpack.c.bf16 %v86_v51, %v85_v50 }
  0xed   :  { %v306_v46 = vmax.f32 %v228_v42, 0.0  ;;  %288 = vmatmul.bf16.gmra.mxu1 %v97_v52  ;;  %241 = vmatmul.bf16.gmra.mxu0 %v97_v52 }
  0xef   :  { %1233 = vmatpush.msra.mxu3 %v306_v46  ;;  %v341_v48 = vpack.c.bf16 %v306_v46, %v305_v45 }
  0xf1   :  { %450 = vmatmul.bf16.gmra.mxu2 %v341_v48  ;;  %479 = vmatmul.bf16.gmra.mxu3 %v341_v48  ;;  %v267_v61 = vpop.f32.mrf.mxu1 }
  0xf2   :  { %1234 = vmatpush.msra.mxu3 %v305_v45  ;;  %v230_v62 = vpop.f32.mrf.mxu0 }
  0xf4   :  { %1235 = vmatpush.msra.mxu3 %v304_v31 }
  0xf6   :  { %1236 = vmatpush.msra.mxu3 %v303_v30 }
  0xf8   :  { %1237 = vmatpush.msra.mxu3 %v302_v23 }
  0xf9   :  { %v269_v56 = vpop.f32.mrf.mxu1 }
  0xfa   :  { %1238 = vmatpush.msra.mxu3 %v301_v22  ;;  %v231_v5 = vpop.f32.mrf.mxu0 }
  0xfc   :  { %1239 = vmatpush.msra.mxu3 %v300_v1  ;;  %v2109_v1 = vperm.slane %v1998_v47, 1 }
  0xfd   :  { %293 = vmatmul.bf16.gmra.mxu1 %v98_v59  ;;  %244 = vmatmul.bf16.gmra.mxu0 %v98_v59 }
  0xfe   :  { %1240 = vmatpush.msra.mxu3 %v299_v0  ;;  %v2106_v0 = vperm.slane %v1361_v63, 1  ;;  %v2113_v7 = vadd.f32 %v269_v56, %v2109_v1 }
 0x100   :  { %v307_v9 = vmax.f32 %v2113_v7, 0.0  ;;  %v1503_v7 = vld [vmem:[%s2600_s3 + $0xe8] sm:$0xf0] }
 0x101   :  { %v271_v4 = vpop.f32.mrf.mxu1 }
 0x102   :  { %v2117_v10 = vadd.f32 %v271_v4, %v2109_v1  ;;  %v233_v14 = vpop.f32.mrf.mxu0 }
 0x104   :  { %v308_v47 = vmax.f32 %v2117_v10, 0.0  ;;  %v1577_v10 = vld [vmem:[%s2600_s3 + $0xe4] sm:$0xf] }
 0x106   :  { %v2127_v15 = vpack.c.bf16 %v308_v47, %v307_v9 }
 0x108   :  { %817 = vmatmul.bf16.vlgmr.msrb.gmra.mxu3 %v2127_v15 }
 0x109   :  { %v2121_v13 = vpop.f32.mrf.mxu1 }
 0x10a   :  { %v234_v23 = vpop.f32.mrf.mxu0 }
 0x111   :  { %v2132_v22 = vpop.f32.mrf.mxu1 }
 0x112   :  { %v236_v35 = vpop.f32.mrf.mxu0 }
 0x119   :  { %v2137_v32 = vpop.f32.mrf.mxu1 }
 0x11a   :  { %v237_v53 = vpop.f32.mrf.mxu0 }
 0x121   :  { %v2144_v50 = vpop.f32.mrf.mxu1 }
 0x129   :  { %v2149_v63 = vpop.f32.mrf.mxu1 }
 0x144   :  { %v465_v2 = vpop.f32.mrf.mxu3  ;;  %v436_v6 = vpop.f32.mrf.mxu2 }
 0x145   :  { %v466_v3 = vadd.f32 %v465_v2, %v2106_v0  ;;  %v437_v27 = vadd.f32 %v436_v6, %v2130_v21  ;;  %v239_v2 = vpop.f32.mrf.mxu0 }
 0x147   :  { %v1426_v8 = vmul.f32 -1.442695, %v466_v3 }
 0x149   :  { %1589 = vpow2.f32 %v1426_v8 }
 0x14c   :  { %v467_v11 = vpop.f32.mrf.mxu3  ;;  %v438_v19 = vpop.f32.mrf.mxu2 }
 0x14d   :  { %v468_v12 = vadd.f32 %v467_v11, %v2106_v0  ;;  %v439_v39 = vadd.f32 %v438_v19, %v2130_v21  ;;  %v240_v19 = vpop.f32.mrf.mxu0 }
 0x14f   :  { %v1590_v16 = vpop.eup %1589  ;;  %v1427_v17 = vmul.f32 -1.442695, %v468_v12 }
 0x150   :  { %v517_v18 = vadd.f32 1.0, %v1590_v16 }
 0x151   :  { %1591 = vpow2.f32 %v1427_v17 }
 0x152   :  { %1593 = vrcp.f32 %v517_v18  ;;  %v536_v34 = vand.u32 2147483648, %v517_v18  ;;  %v534_v36 = vand.u32 2147483647, %v517_v18  ;;  %vm530_vm1 = vweird.f32 %v517_v18 }
 0x154   :  { %v470_v20 = vpop.f32.mrf.mxu3  ;;  %v2135_v29 = vpop.f32.mrf.mxu2  ;;  %v537_v42 = vor.u32 1.1754944e-38, %v536_v34  ;;  %vm535_vm3 = vcmp.eq.f32.partialorder %v534_v36, 8.507059e+37 }
 0x155   :  { %v471_v5 = vadd.f32 %v470_v20, %v2106_v0 }
 0x157   :  { %v1592_v24 = vpop.eup %1591  ;;  %v1428_v12 = vmul.f32 -1.442695, %v471_v5 }
 0x158   :  { %v1594_v25 = vpop.eup %1593  ;;  %v518_v26 = vadd.f32 1.0, %v1592_v24 }
 0x159   :  { %v526_v28 = vmul.f32 %v1594_v25, %v517_v18  ;;  %vm531_vm0 = vweird.f32 %v1594_v25  ;;  %v2157_v18 = vpop.f32.mrf.mxu1 }
 0x15a   :  { %1595 = vrcp.f32 %v518_v26  ;;  %vm532_vm2 = vmor %vm530_vm1, %vm531_vm0  ;;  %v551_v52 = vand.u32 2147483648, %v518_v26  ;;  %v549_v54 = vand.u32 2147483647, %v518_v26  ;;  %vm545_vm5 = vweird.f32 %v518_v26 }
 0x15b   :  { %v527_v30 = vsub.f32 1.0, %v526_v28  ;;  %1597 = vtanh.f32 %v437_v27 }
 0x15c   :  { %v472_v31 = vpop.f32.mrf.mxu3  ;;  %v2140_v46 = vpop.f32.mrf.mxu2  ;;  %1599 = vtanh.f32 %v439_v39  ;;  %v552_v59 = vor.u32 1.1754944e-38, %v551_v52  ;;  %vm550_vm7 = vcmp.eq.f32.partialorder %v549_v54, 8.507059e+37 }
 0x15d   :  { %v528_v33 = vmul.f32 %v1594_v25, %v527_v30  ;;  %v473_v8 = vadd.f32 %v472_v31, %v2106_v0 }
 0x15f   :  { %v529_v37 = vadd.f32 %v1594_v25, %v528_v33  ;;  %v1429_v14 = vmul.f32 -1.442695, %v473_v8 }
 0x160   :  { %v1596_v38 = vpop.eup %1595 }
 0x161   :  { %v541_v40 = vmul.f32 %v1596_v38, %v518_v26  ;;  %v533_v41 = vsel %vm532_vm2, %v1594_v25, %v529_v37  ;;  %v1598_v43 = vpop.eup %1597  ;;  %vm546_vm4 = vweird.f32 %v1596_v38 }
 0x162   :  { %v538_v45 = vsel %vm535_vm3, %v537_v42, %v533_v41  ;;  %vm547_vm6 = vmor %vm545_vm5, %vm546_vm4  ;;  %v1600_v60 = vpop.eup %1599 }
 0x163   :  { %v542_v44 = vsub.f32 1.0, %v541_v40  ;;  %v2142_v49 = vmul.f32 %v1598_v43, %v538_v45 }
 0x164   :  { %v475_v48 = vpop.f32.mrf.mxu3  ;;  %v2151_v3 = vpop.f32.mrf.mxu2 }
 0x165   :  { %v543_v51 = vmul.f32 %v1596_v38, %v542_v44  ;;  %v476_v58 = vadd.f32 %v475_v48, %v2106_v0 }
 0x167   :  { %v544_v55 = vadd.f32 %v1596_v38, %v543_v51  ;;  %v1430_v6 = vmul.f32 -1.442695, %v476_v58 }
 0x169   :  { %v548_v57 = vsel %vm547_vm6, %v1596_v38, %v544_v55  ;;  %1601 = vpow2.f32 %v1430_v6 }
 0x16a   :  { %v553_v61 = vsel %vm550_vm7, %v552_v59, %v548_v57  ;;  %v2162_v31 = vpop.f32.mrf.mxu1  ;;  %v242_v33 = vpop.f32.mrf.mxu0 }
 0x16b   :  { %v2147_v56 = vmul.f32 %v1600_v60, %v553_v61 }
 0x16c   :  { %v477_v62 = vpop.f32.mrf.mxu3  ;;  %v448_v24 = vpop.f32.mrf.mxu2 }
 0x16d   :  { %v478_v4 = vadd.f32 %v477_v62, %v2106_v0 }
 0x16f   :  { %v1431_v11 = vmul.f32 -1.442695, %v478_v4  ;;  %v1602_v25 = vpop.eup %1601 }
 0x170   :  { %v2159_v26 = vadd.f32 1.0, %v1602_v25 }
 0x171   :  { %1603 = vpow2.f32 %v1431_v11  ;;  %v2205_v11 = vadd.f32 %v2121_v13, %v2109_v1 }
 0x172   :  { %1605 = vpow2.f32 %v1428_v12  ;;  %v243_v42 = vpop.f32.mrf.mxu0  ;;  %vm590_vm5 = vweird.f32 %v2159_v26 }
 0x173   :  { %1607 = vpow2.f32 %v1429_v14  ;;  %v2209_v14 = vadd.f32 %v2140_v46, %v2130_v21 }
 0x174   :  { %v480_v16 = vpop.f32.mrf.mxu3  ;;  %v451_v41 = vpop.f32.mrf.mxu2 }
 0x175   :  { %v481_v17 = vadd.f32 %v480_v16, %v2106_v0  ;;  %v452_v62 = vadd.f32 %v451_v41, %v2130_v21  ;;  %v2213_v16 = vadd.f32 %v2151_v3, %v2130_v21 }
 0x177   :  { %v1432_v23 = vmul.f32 -1.442695, %v481_v17  ;;  %v1604_v20 = vpop.eup %1603 }
 0x178   :  { %v1606_v28 = vpop.eup %1605  ;;  %v2164_v36 = vadd.f32 1.0, %v1604_v20  ;;  %v2221_v20 = vadd.f32 %v2157_v18, %v2109_v1 }
 0x179   :  { %1609 = vpow2.f32 %v1432_v23  ;;  %v1608_v34 = vpop.eup %1607  ;;  %v2166_v38 = vadd.f32 1.0, %v1606_v28  ;;  %v449_v23 = vadd.f32 %v448_v24, %v2130_v21 }
 0x17a   :  { %1611 = vrcp.f32 %v2159_v26  ;;  %v2171_v40 = vadd.f32 1.0, %v1608_v34  ;;  %v245_v61 = vpop.f32.mrf.mxu0  ;;  %vm605_vm1 = vweird.f32 %v2164_v36 }
 0x17c   :  { %v482_v27 = vpop.f32.mrf.mxu3  ;;  %v453_v57 = vpop.f32.mrf.mxu2 }
 0x17d   :  { %v483_v30 = vadd.f32 %v482_v27, %v2106_v0  ;;  %v291_v0 = vpop.f32.mrf.mxu1  ;;  %v454_v5 = vadd.f32 %v453_v57, %v2130_v21 }
 0x17e   :  { %v2233_v41 = vadd.f32 %v291_v0, %v2109_v1 }
 0x17f   :  { %v1610_v35 = vpop.eup %1609  ;;  %v1433_v37 = vmul.f32 -1.442695, %v483_v30 }
 0x180   :  { %v2169_v39 = vadd.f32 1.0, %v1610_v35  ;;  %v2177_v43 = vpop.eup %1611 }
 0x181   :  { %1613 = vpow2.f32 %v1433_v37  ;;  %v586_v55 = vmul.f32 %v2177_v43, %v2159_v26  ;;  %vm591_vm3 = vweird.f32 %v2177_v43 }
 0x182   :  { %1615 = vrcp.f32 %v2169_v39  ;;  %v246_v37 = vpop.f32.mrf.mxu0  ;;  %vm620_vm10 = vweird.f32 %v2169_v39  ;;  %v626_v18 = vand.u32 2147483648, %v2169_v39  ;;  %v624_v57 = vand.u32 2147483647, %v2169_v39  ;;  %vm2300_vm6 = vmor %vm590_vm5, %vm591_vm3 }
 0x183   :  { %1617 = vrcp.f32 %v2164_v36  ;;  %v587_v6 = vsub.f32 1.0, %v586_v55 }
 0x184   :  { %1619 = vrcp.f32 %v2166_v38  ;;  %vm625_vm0 = vcmp.eq.f32.partialorder %v624_v57, 8.507059e+37  ;;  %v581_v57 = vand.u32 2147483648, %v2171_v40 }
 0x185   :  { %1621 = vrcp.f32 %v2171_v40  ;;  %v294_v58 = vpop.f32.mrf.mxu1  ;;  %v588_v27 = vmul.f32 %v2177_v43, %v587_v6  ;;  %v611_v6 = vand.u32 2147483648, %v2164_v36 }
 0x186   :  { %v2227_v24 = vadd.f32 %v294_v58, %v2109_v1 }
 0x187   :  { %v1614_v44 = vpop.eup %1613 }
 0x188   :  { %v2179_v45 = vpop.eup %1615  ;;  %v524_v48 = vadd.f32 1.0, %v1614_v44  ;;  %v2240_v44 = vadd.f32 %v2162_v31, %v2109_v1 }
 0x189   :  { %v2181_v51 = vpop.eup %1617  ;;  %v616_v52 = vmul.f32 %v2179_v45, %v2169_v39  ;;  %vm621_vm8 = vweird.f32 %v2179_v45 }
 0x18a   :  { %v2185_v53 = vpop.eup %1619  ;;  %1623 = vrcp.f32 %v524_v48  ;;  %v601_v59 = vmul.f32 %v2181_v51, %v2164_v36  ;;  %v641_v3 = vand.u32 2147483648, %v524_v48  ;;  %v639_v33 = vand.u32 2147483647, %v524_v48  ;;  %vm2244_vm12 = vmor %vm620_vm10, %vm621_vm8 }
 0x18b   :  { %v2187_v54 = vpop.eup %1621  ;;  %v617_v60 = vsub.f32 1.0, %v616_v52  ;;  %v2200_v4 = vmul.f32 %v2185_v53, %v2166_v38  ;;  %1625 = vtanh.f32 %v452_v62  ;;  %vm635_vm11 = vweird.f32 %v524_v48 }
 0x18c   :  { %v2196_v2 = vmul.f32 %v2187_v54, %v2171_v40  ;;  %v602_v12 = vsub.f32 1.0, %v601_v59  ;;  %1627 = vtanh.f32 %v454_v5  ;;  %v642_v0 = vor.u32 1.1754944e-38, %v641_v3 }
 0x18d   :  { %v618_v19 = vmul.f32 %v2179_v45, %v617_v60  ;;  %v557_v13 = vsub.f32 1.0, %v2200_v4  ;;  %v296_v35 = vpop.f32.mrf.mxu1  ;;  %vm606_vm14 = vweird.f32 %v2181_v51  ;;  %v317_v60 = vmax.f32 %v2227_v24, 0.0  ;;  %v1450_v24 = vld [vmem:[%s2601_s4 + $0x2] ss:$8 sm:$0x3] }
 0x18e   :  { %v572_v25 = vsub.f32 1.0, %v2196_v2  ;;  %v603_v28 = vmul.f32 %v2181_v51, %v602_v12  ;;  %v2236_v42 = vadd.f32 %v296_v35, %v2109_v1  ;;  %vm640_vm15 = vcmp.eq.f32.partialorder %v639_v33, 8.507059e+37  ;;  %vm2270_vm2 = vmor %vm605_vm1, %vm606_vm14  ;;  %v1569_v35 = vld [vmem:[%s2600_s3 + $0xa4] sm:$0xf] }
 0x18f   :  { %v619_v34 = vadd.f32 %v2179_v45, %v618_v19  ;;  %v627_v2 = vor.u32 1.1754944e-38, %v626_v18  ;;  %v316_v5 = vmax.f32 %v2233_v41, 0.0  ;;  %1629 = vtanh.f32 %v449_v23  ;;  %v818_v41 = vpop.f32.mrf.mxu3 }
 0x190   :  { %v1624_v8 = vpop.eup %1623  ;;  %v318_v31 = vmax.f32 %v2236_v42, 0.0  ;;  %v604_v62 = vadd.f32 %v2181_v51, %v603_v28  ;;  %v573_v23 = vmul.f32 %v2187_v54, %v572_v25  ;;  %v2284_v3 = vadd.f32 %v2144_v50, %v2109_v1 }
 0x191   :  { %v631_v17 = vmul.f32 %v1624_v8, %v524_v48  ;;  %vm636_vm9 = vweird.f32 %v1624_v8  ;;  %v1626_v59 = vpop.eup %1625  ;;  %v623_v61 = vsel %vm2244_vm12, %v2179_v45, %v619_v34  ;;  %v2265_v45 = vadd.f32 %v2149_v63, %v2109_v1 }
 0x192   :  { %vm637_vm13 = vmor %vm635_vm11, %vm636_vm9  ;;  %v1628_v58 = vpop.eup %1627  ;;  %1192 = vmatpush.msrb.mxu1 %v318_v31  ;;  %v628_v19 = vsel %vm625_vm0, %v627_v2, %v623_v61  ;;  %v589_v63 = vadd.f32 %v2177_v43, %v588_v27  ;;  %v314_v28 = vmax.f32 %v2221_v20, 0.0  ;;  %v596_v33 = vand.u32 2147483648, %v2159_v26 }
 0x193   :  { %v632_v46 = vsub.f32 1.0, %v631_v17  ;;  %v315_v17 = vmax.f32 %v2240_v44, 0.0  ;;  %v651_v34 = vmul.f32 %v1626_v59, %v628_v19  ;;  %1631 = vtanh.f32 %v2213_v16 }
 0x194   :  { %1193 = vmatpush.msrb.mxu1 %v317_v60  ;;  %v2295_v50 = vadd.f32 %v2137_v32, %v2109_v1  ;;  %v313_v25 = vmax.f32 %v2265_v45, 0.0  ;;  %v574_v32 = vadd.f32 %v2187_v54, %v573_v23  ;;  %vm576_vm7 = vweird.f32 %v2187_v54 }
 0x195   :  { %v633_v30 = vmul.f32 %v1624_v8, %v632_v46  ;;  %v558_v16 = vmul.f32 %v2185_v53, %v557_v13  ;;  %v1630_v37 = vpop.eup %1629  ;;  %v277_v18 = vadd.f32 %v2132_v22, %v2109_v1  ;;  %v597_v55 = vor.u32 1.1754944e-38, %v596_v33 }
 0x196   :  { %1194 = vmatpush.msrb.mxu1 %v316_v5  ;;  %vm575_vm9 = vweird.f32 %v2171_v40  ;;  %v579_v4 = vand.u32 2147483647, %v2171_v40  ;;  %v442_v13 = vadd.f32 %v2135_v29, %v2130_v21  ;;  %1633 = vtanh.f32 %v2209_v14 }
 0x197   :  { %v634_v52 = vadd.f32 %v1624_v8, %v633_v30  ;;  %v612_v30 = vor.u32 1.1754944e-38, %v611_v6  ;;  %v311_v1 = vmax.f32 %v2295_v50, 0.0  ;;  %vm2328_vm10 = vmor %vm575_vm9, %vm576_vm7  ;;  %v559_v21 = vadd.f32 %v2185_v53, %v558_v16  ;;  %v1567_v16 = vld [vmem:[%s2600_s3 + $0x94] sm:$0xf] }
 0x198   :  { %1195 = vmatpush.msrb.mxu1 %v315_v17  ;;  %v578_v40 = vsel %vm2328_vm10, %v2187_v54, %v574_v32  ;;  %vm561_vm11 = vweird.f32 %v2185_v53  ;;  %v310_v14 = vmax.f32 %v277_v18, 0.0  ;;  %vm580_vm12 = vcmp.eq.f32.partialorder %v579_v4, 8.507059e+37  ;;  %v1565_v18 = vld [vmem:[%s2600_s3 + $0x84] sm:$0xf] }
 0x199   :  { %v638_v48 = vsel %vm637_vm13, %v1624_v8, %v634_v52  ;;  %v609_v8 = vand.u32 2147483647, %v2164_v36  ;;  %v608_v36 = vsel %vm2270_vm2, %v2181_v51, %v604_v62  ;;  %v594_v51 = vand.u32 2147483647, %v2159_v26  ;;  %v1632_v29 = vpop.eup %1631 }
 0x19a   :  { %v643_v39 = vsel %vm640_vm15, %v642_v0, %v638_v48  ;;  %v593_v26 = vsel %vm2300_vm6, %v2177_v43, %v589_v63  ;;  %v312_v52 = vmax.f32 %v2284_v3, 0.0  ;;  %1196 = vmatpush.msrb.mxu1 %v314_v28  ;;  %v582_v0 = vor.u32 1.1754944e-38, %v581_v57  ;;  %v1495_v63 = vld [vmem:[%s2600_s3 + $0xd8] sm:$0xf0] }
 0x19b   :  { %v652_v12 = vmul.f32 %v1628_v58, %v643_v39  ;;  %vm610_vm4 = vcmp.eq.f32.partialorder %v609_v8, 8.507059e+37  ;;  %vm595_vm8 = vcmp.eq.f32.partialorder %v594_v51, 8.507059e+37  ;;  %v566_v58 = vand.u32 2147483648, %v2166_v38  ;;  %v1479_v51 = vld [vmem:[%s2600_s3 + $0xb8] sm:$0xf0] }
 0x19c   :  { %v613_v27 = vsel %vm610_vm4, %v612_v30, %v608_v36  ;;  %v598_v22 = vsel %vm595_vm8, %v597_v55, %v593_v26  ;;  %1197 = vmatpush.msrb.mxu1 %v313_v25  ;;  %vm560_vm13 = vweird.f32 %v2166_v38  ;;  %v564_v61 = vand.u32 2147483647, %v2166_v38  ;;  %v1634_v2 = vpop.eup %1633  ;;  %v1487_v30 = vld [vmem:[%s2600_s3 + $0xc8] sm:$0xf0]  ;;  %v1463_v3 = vld [vmem:[%s2600_s3 + $0x98] sm:$0xf0] }
 0x19d   :  { %661 = vmatpush.xpose.msrb.mxu2 %v652_v12  ;;  %v650_v43 = vmul.f32 %v1630_v37, %v613_v27  ;;  %v649_v48 = vmul.f32 %v1632_v29, %v598_v22  ;;  %1635 = vtanh.f32 %v442_v13  ;;  %v309_v54 = vmax.f32 %v2205_v11, 0.0  ;;  %vm562_vm14 = vmor %vm560_vm13, %vm561_vm11  ;;  %v1511_v11 = vld [vmem:[%s2600_s3 + $0xf8] sm:$0xf0]  ;;  %v1471_v26 = vld [vmem:[%s2600_s3 + $0xa8] sm:$0xf0] }
 0x19e   :  { %1198 = vmatpush.msrb.mxu1 %v312_v52  ;;  %v583_v62 = vsel %vm580_vm12, %v582_v0, %v578_v40  ;;  %v563_v39 = vsel %vm562_vm14, %v2185_v53, %v559_v21  ;;  %v567_v6 = vor.u32 1.1754944e-38, %v566_v58  ;;  %vm565_vm15 = vcmp.eq.f32.partialorder %v564_v61, 8.507059e+37  ;;  %v1579_v53 = vld [vmem:[%s2600_s3 + $0xf4] sm:$0xf] }
 0x19f   :  { %v648_v12 = vmul.f32 %v1634_v2, %v583_v62  ;;  %v1514_v46 = vor.u32 %v1579_v53, %v1511_v11  ;;  %v719_v36 = vpack.c.bf16 %v310_v14, %v309_v54  ;;  %v720_v50 = vpack.c.bf16 %v312_v52, %v311_v1  ;;  %v1455_v52 = vld [vmem:[%s2600_s3 + $0x88] sm:$0xf0] }
 0x1a0   :  { %1199 = vmatpush.msrb.mxu1 %v311_v1  ;;  %v568_v8 = vsel %vm565_vm15, %v567_v6, %v563_v39  ;;  %v1474_v32 = vor.u32 %v1569_v35, %v1471_v26  ;;  %v1466_v37 = vor.u32 %v1567_v16, %v1463_v3  ;;  %v1458_v55 = vor.u32 %v1565_v18, %v1455_v52 }
 0x1a1   :  { %662 = vmatpush.xpose.msrb.mxu2 %v651_v34  ;;  %822 = vmatmul.bf16.gmra.mxu3 %v719_v36  ;;  %v1571_v34 = vld [vmem:[%s2600_s3 + $0xb4] sm:$0xf]  ;;  %v721_v57 = vpack.c.bf16 %v314_v28, %v313_v25  ;;  %v723_v4 = vpack.c.bf16 %v318_v31, %v317_v60  ;;  %vm673_vm0 = vcmask 516096   ;;  %v2425_v44 = vperm.slane %v1450_v24, 1 }
 0x1a2   :  { %1200 = vmatpush.msrb.mxu1 %v310_v14  ;;  %v1482_v27 = vor.u32 %v1571_v34, %v1479_v51  ;;  %v2429_v22 = vperm.slane %v1450_v24, 0 }
 0x1a3   :  { %v1636_v19 = vpop.eup %1635 }
 0x1a4   :  { %1201 = vmatpush.msrb.mxu1 %v309_v54  ;;  %v647_v38 = vmul.f32 %v1636_v19, %v568_v8  ;;  %v819_v0 = vadd.f32 %v818_v41, %v2429_v22 }
 0x1a5   :  { %663 = vmatpush.xpose.msrb.mxu2 %v650_v43  ;;  %v722_v43 = vpack.c.bf16 %v316_v5, %v315_v17  ;;  %v820_v5 = vpop.f32.mrf.mxu3 }
 0x1a6   :  { %1202 = vmatpush.msrb.mxu1 %v308_v47  ;;  %v1506_v47 = vor.u32 %v1577_v10, %v1503_v7  ;;  %v821_v11 = vadd.f32 %v820_v5, %v2429_v22 }
 0x1a8   :  { %1203 = vmatpush.msrb.mxu1 %v307_v9  ;;  %v337_v9 = vld [vmem:[%s2601_s4 + $0x3] ss:$0 sm:$0xff] }
 0x1a9   :  { %664 = vmatpush.xpose.msrb.mxu2 %v649_v48 }
 0x1ad   :  { %665 = vmatpush.xpose.msrb.mxu2 %v648_v12 }
 0x1b1   :  { %666 = vmatpush.xpose.msrb.mxu2 %v647_v38  ;;  %827 = vmatmul.bf16.gmra.mxu3 %v720_v50 }
 0x1b5   :  { %667 = vmatpush.xpose.msrb.mxu2 %v2147_v56  ;;  %v1575_v56 = vld [vmem:[%s2600_s3 + $0xd4] sm:$0xf] }
 0x1b6   :  { %v1498_v23 = vor.u32 %v1575_v56, %v1495_v63 }
 0x1b9   :  { %668 = vmatpush.xpose.msrb.mxu2 %v2142_v49  ;;  %v1573_v49 = vld [vmem:[%s2600_s3 + $0xc4] sm:$0xf] }
 0x1ba   :  { %v1490_v33 = vor.u32 %v1573_v49, %v1487_v30 }
 0x1bc   :  { %669 = vmatmul.f32.vlgmr.msrb.gmra.mxu2 %v337_v9 }
 0x1bd   :  { %848 = vmatpush.bf16.msra.mxu2 %v1514_v46 }
 0x1c1   :  { %849 = vmatpush.bf16.msra.mxu2 %v1506_v47  ;;  %832 = vmatmul.bf16.gmra.mxu3 %v721_v57 }
 0x1c5   :  { %850 = vmatpush.bf16.msra.mxu2 %v1498_v23 }
 0x1c9   :  { %851 = vmatpush.bf16.msra.mxu2 %v1490_v33 }
 0x1cd   :  { %852 = vmatpush.bf16.msra.mxu2 %v1482_v27 }
 0x1d1   :  { %853 = vmatpush.bf16.msra.mxu2 %v1474_v32  ;;  %837 = vmatmul.bf16.gmra.mxu3 %v722_v43 }
 0x1d5   :  { %854 = vmatpush.bf16.msra.mxu2 %v1466_v37 }
 0x1d9   :  { %855 = vmatpush.bf16.msra.mxu2 %v1458_v55 }
 0x1dc   :  { %856 = vmatmul.bf16.vlgmr.msra.gmra.mxu2 %v2127_v15 }
 0x1e1   :  { %842 = vmatmul.bf16.gmra.mxu3 %v723_v4 }
 0x1ec   :  { %861 = vmatmul.bf16.gmra.mxu2 %v719_v36 }
 0x1fc   :  { %866 = vmatmul.bf16.gmra.mxu2 %v720_v50 }
 0x20c   :  { %871 = vmatmul.bf16.gmra.mxu2 %v721_v57 }
 0x21c   :  { %876 = vmatmul.bf16.gmra.mxu2 %v722_v43 }
 0x224   :  { %v823_v1 = vpop.f32.mrf.mxu3 }
 0x225   :  { %v824_v32 = vadd.f32 %v823_v1, %v2429_v22 }
 0x22c   :  { %881 = vmatmul.bf16.gmra.mxu2 %v723_v4  ;;  %v2433_v54 = vpop.f32.mrf.mxu3 }
 0x234   :  { %v828_v34 = vpop.f32.mrf.mxu3 }
 0x23f   :  { %v2418_v20 = vpop.f32.mrf.mxu2 }
 0x240   :  { %v674_v15 = vsel %vm673_vm0, %v2418_v20, -inf }
 0x241   :  { %675 = vmax.xlane.f32.xlu0 %v674_v15 }
 0x25f   :  { %v857_v42 = vpop.f32.mrf.mxu2 }
 0x260   :  { %v858_v60 = vadd.f32 %v857_v42, %v2425_v44 }
 0x262   :  { %v1515_v31 = vmul.f32 -1.442695, %v858_v60 }
 0x264   :  { %1637 = vpow2.f32 %v1515_v31 }
 0x267   :  { %v859_v45 = vpop.f32.mrf.mxu2 }
 0x268   :  { %v860_v17 = vadd.f32 %v859_v45, %v2425_v44 }
 0x26a   :  { %v1638_v28 = vpop.eup %1637  ;;  %v1516_v25 = vmul.f32 -1.442695, %v860_v17  ;;  %v826_v17 = vadd.f32 %v2433_v54, %v2429_v22 }
 0x26b   :  { %v935_v13 = vadd.f32 1.0, %v1638_v28  ;;  %v830_v28 = vpop.f32.mrf.mxu3 }
 0x26c   :  { %1639 = vpow2.f32 %v1516_v25 }
 0x26d   :  { %1641 = vrcp.f32 %v935_v13  ;;  %v958_v6 = vand.u32 2147483648, %v935_v13  ;;  %v956_v12 = vand.u32 2147483647, %v935_v13  ;;  %vm952_vm2 = vweird.f32 %v935_v13 }
 0x26f   :  { %v862_v59 = vpop.f32.mrf.mxu2  ;;  %v959_v7 = vor.u32 1.1754944e-38, %v958_v6  ;;  %vm957_vm4 = vcmp.eq.f32.partialorder %v956_v12, 8.507059e+37  ;;  %v829_v6 = vadd.f32 %v828_v34, %v2429_v22 }
 0x270   :  { %v863_v40 = vadd.f32 %v862_v59, %v2425_v44 }
 0x272   :  { %v1640_v21 = vpop.eup %1639  ;;  %v1517_v29 = vmul.f32 -1.442695, %v863_v40 }
 0x273   :  { %v1642_v14 = vpop.eup %1641  ;;  %v936_v58 = vadd.f32 1.0, %v1640_v21 }
 0x274   :  { %1643 = vpow2.f32 %v1517_v29  ;;  %v948_v48 = vmul.f32 %v1642_v14, %v935_v13  ;;  %vm953_vm1 = vweird.f32 %v1642_v14 }
 0x275   :  { %1645 = vrcp.f32 %v936_v58  ;;  %vm954_vm3 = vmor %vm952_vm2, %vm953_vm1  ;;  %v973_v33 = vand.u32 2147483648, %v936_v58  ;;  %v971_v51 = vand.u32 2147483647, %v936_v58  ;;  %vm967_vm6 = vweird.f32 %v936_v58 }
 0x276   :  { %v949_v61 = vsub.f32 1.0, %v948_v48  ;;  %1647 = vtanh.f32 %v819_v0 }
 0x277   :  { %v864_v62 = vpop.f32.mrf.mxu2  ;;  %v974_v18 = vor.u32 1.1754944e-38, %v973_v33  ;;  %vm972_vm8 = vcmp.eq.f32.partialorder %v971_v51, 8.507059e+37 }
 0x278   :  { %v865_v39 = vadd.f32 %v864_v62, %v2425_v44  ;;  %v950_v2 = vmul.f32 %v1642_v14, %v949_v61 }
 0x27a   :  { %v1644_v8 = vpop.eup %1643  ;;  %v1518_v19 = vmul.f32 -1.442695, %v865_v39  ;;  %v951_v38 = vadd.f32 %v1642_v14, %v950_v2 }
 0x27b   :  { %v1646_v53 = vpop.eup %1645  ;;  %v937_v46 = vadd.f32 1.0, %v1644_v8 }
 0x27c   :  { %1649 = vpow2.f32 %v1518_v19  ;;  %v963_v36 = vmul.f32 %v1646_v53, %v936_v58  ;;  %v955_v10 = vsel %vm954_vm3, %v1642_v14, %v951_v38  ;;  %v1648_v9 = vpop.eup %1647  ;;  %vm968_vm5 = vweird.f32 %v1646_v53  ;;  %v2451_v38 = vpop.f32.mrf.mxu3 }
 0x27d   :  { %1651 = vrcp.f32 %v937_v46  ;;  %v960_v56 = vsel %vm957_vm4, %v959_v7, %v955_v10  ;;  %vm969_vm7 = vmor %vm967_vm6, %vm968_vm5  ;;  %v988_v24 = vand.u32 2147483648, %v937_v46  ;;  %v986_v42 = vand.u32 2147483647, %v937_v46 }
 0x27e   :  { %v964_v47 = vsub.f32 1.0, %v963_v36  ;;  %1653 = vtanh.f32 %v821_v11  ;;  %v2437_v23 = vmul.f32 %v1648_v9, %v960_v56  ;;  %vm982_vm10 = vweird.f32 %v937_v46 }
 0x27f   :  { %v867_v63 = vpop.f32.mrf.mxu2  ;;  %v989_v59 = vor.u32 1.1754944e-38, %v988_v24  ;;  %vm987_vm12 = vcmp.eq.f32.partialorder %v986_v42, 8.507059e+37 }
 0x280   :  { %v868_v49 = vadd.f32 %v867_v63, %v2425_v44  ;;  %v965_v30 = vmul.f32 %v1646_v53, %v964_v47 }
 0x282   :  { %v1650_v50 = vpop.eup %1649  ;;  %v1519_v27 = vmul.f32 -1.442695, %v868_v49  ;;  %v966_v35 = vadd.f32 %v1646_v53, %v965_v30  ;;  %v831_v49 = vadd.f32 %v830_v28, %v2429_v22 }
 0x283   :  { %v1652_v26 = vpop.eup %1651  ;;  %v938_v16 = vadd.f32 1.0, %v1650_v50 }
 0x284   :  { %1655 = vpow2.f32 %v1519_v27  ;;  %v978_v3 = vmul.f32 %v1652_v26, %v937_v46  ;;  %v970_v37 = vsel %vm969_vm7, %v1646_v53, %v966_v35  ;;  %v1654_v52 = vpop.eup %1653  ;;  %vm983_vm9 = vweird.f32 %v1652_v26  ;;  %v2456_v35 = vpop.f32.mrf.mxu3 }
 0x285   :  { %1657 = vrcp.f32 %v938_v16  ;;  %v975_v57 = vsel %vm972_vm8, %v974_v18, %v970_v37  ;;  %vm984_vm11 = vmor %vm982_vm10, %vm983_vm9  ;;  %v1003_v48 = vand.u32 2147483648, %v938_v16  ;;  %v1001_v61 = vand.u32 2147483647, %v938_v16 }
 0x286   :  { %v979_v55 = vsub.f32 1.0, %v978_v3  ;;  %1659 = vtanh.f32 %v824_v32  ;;  %v2441_v4 = vmul.f32 %v1654_v52, %v975_v57  ;;  %vm997_vm14 = vweird.f32 %v938_v16 }
 0x287   :  { %v869_v43 = vpop.f32.mrf.mxu2  ;;  %v1004_v19 = vor.u32 1.1754944e-38, %v1003_v48  ;;  %vm1002_vm1 = vcmp.eq.f32.partialorder %v1001_v61, 8.507059e+37 }
 0x288   :  { %v870_v15 = vadd.f32 %v869_v43, %v2425_v44  ;;  %v980_v41 = vmul.f32 %v1652_v26, %v979_v55 }
 0x28a   :  { %v1656_v60 = vpop.eup %1655  ;;  %v1520_v31 = vmul.f32 -1.442695, %v870_v15  ;;  %v981_v5 = vadd.f32 %v1652_v26, %v980_v41 }
 0x28b   :  { %v1658_v45 = vpop.eup %1657  ;;  %v939_v25 = vadd.f32 1.0, %v1656_v60 }
 0x28c   :  { %1661 = vpow2.f32 %v1520_v31  ;;  %v993_v13 = vmul.f32 %v1658_v45, %v938_v16  ;;  %v985_v1 = vsel %vm984_vm11, %v1652_v26, %v981_v5  ;;  %v1660_v40 = vpop.eup %1659  ;;  %vm998_vm13 = vweird.f32 %v1658_v45  ;;  %v2463_v42 = vpop.f32.mrf.mxu3 }
 0x28d   :  { %1663 = vrcp.f32 %v939_v25  ;;  %v990_v29 = vsel %vm987_vm12, %v989_v59, %v985_v1  ;;  %vm999_vm15 = vmor %vm997_vm14, %vm998_vm13  ;;  %v1018_v9 = vand.u32 2147483648, %v939_v25  ;;  %v1016_v47 = vand.u32 2147483647, %v939_v25 }
 0x28e   :  { %v994_v21 = vsub.f32 1.0, %v993_v13  ;;  %v2448_v0 = vmul.f32 %v1660_v40, %v990_v29  ;;  %1665 = vtanh.f32 %v826_v17  ;;  %vm1012_vm3 = vweird.f32 %v939_v25 }
 0x28f   :  { %v2446_v14 = vpop.f32.mrf.mxu2  ;;  %v1019_v34 = vor.u32 1.1754944e-38, %v1018_v9  ;;  %vm1017_vm5 = vcmp.eq.f32.partialorder %v1016_v47, 8.507059e+37 }
 0x290   :  { %v995_v58 = vmul.f32 %v1658_v45, %v994_v21 }
 0x292   :  { %v1662_v54 = vpop.eup %1661  ;;  %v996_v62 = vadd.f32 %v1658_v45, %v995_v58 }
 0x293   :  { %v1664_v39 = vpop.eup %1663  ;;  %v940_v2 = vadd.f32 1.0, %v1662_v54 }
 0x294   :  { %v1008_v12 = vmul.f32 %v1664_v39, %v939_v25  ;;  %v1000_v8 = vsel %vm999_vm15, %v1658_v45, %v996_v62  ;;  %v1666_v53 = vpop.eup %1665  ;;  %vm1013_vm2 = vweird.f32 %v1664_v39  ;;  %v873_v25 = vadd.f32 %v2446_v14, %v2425_v44  ;;  %v2470_v1 = vpop.f32.mrf.mxu3 }
 0x295   :  { %1667 = vrcp.f32 %v940_v2  ;;  %v1005_v46 = vsel %vm1002_vm1, %v1004_v19, %v1000_v8  ;;  %vm1014_vm4 = vmor %vm1012_vm3, %vm1013_vm2  ;;  %v1033_v3 = vand.u32 2147483648, %v940_v2  ;;  %v1031_v37 = vand.u32 2147483647, %v940_v2 }
 0x296   :  { %v1009_v11 = vsub.f32 1.0, %v1008_v12  ;;  %v2453_v10 = vmul.f32 %v1666_v53, %v1005_v46  ;;  %1669 = vtanh.f32 %v829_v6  ;;  %vm1027_vm7 = vweird.f32 %v940_v2 }
 0x297   :  { %v874_v36 = vpop.f32.mrf.mxu2  ;;  %1671 = vtanh.f32 %v831_v49  ;;  %v1034_v55 = vor.u32 1.1754944e-38, %v1033_v3  ;;  %vm1032_vm9 = vcmp.eq.f32.partialorder %v1031_v37, 8.507059e+37  ;;  %v1521_v21 = vmul.f32 -1.442695, %v873_v25 }
 0x298   :  { %v1010_v7 = vmul.f32 %v1664_v39, %v1009_v11  ;;  %v875_v5 = vadd.f32 %v874_v36, %v2425_v44 }
 0x29a   :  { %v1011_v56 = vadd.f32 %v1664_v39, %v1010_v7  ;;  %v1522_v59 = vmul.f32 -1.442695, %v875_v5  ;;  %v841_v5 = vadd.f32 %v2470_v1, %v2429_v22 }
 0x29b   :  { %v1668_v63 = vpop.eup %1667 }
 0x29c   :  { %v1023_v30 = vmul.f32 %v1668_v63, %v940_v2  ;;  %v1015_v33 = vsel %vm1014_vm4, %v1664_v39, %v1011_v56  ;;  %v1670_v51 = vpop.eup %1669  ;;  %vm1028_vm6 = vweird.f32 %v1668_v63  ;;  %v843_v8 = vpop.f32.mrf.mxu3 }
 0x29d   :  { %v1020_v27 = vsel %vm1017_vm5, %v1019_v34, %v1015_v33  ;;  %vm1029_vm8 = vmor %vm1027_vm7, %vm1028_vm6  ;;  %v1672_v57 = vpop.eup %1671  ;;  %v844_v37 = vadd.f32 %v843_v8, %v2429_v22 }
 0x29e   :  { %v1024_v50 = vsub.f32 1.0, %v1023_v30  ;;  %v2458_v32 = vmul.f32 %v1670_v51, %v1020_v27 }
 0x29f   :  { %v877_v26 = vpop.f32.mrf.mxu2 }
 0x2a0   :  { %v1025_v16 = vmul.f32 %v1668_v63, %v1024_v50  ;;  %v878_v31 = vadd.f32 %v877_v26, %v2425_v44 }
 0x2a2   :  { %v1026_v18 = vadd.f32 %v1668_v63, %v1025_v16  ;;  %v1523_v28 = vmul.f32 -1.442695, %v878_v31 }
 0x2a4   :  { %v1030_v52 = vsel %vm1029_vm8, %v1668_v63, %v1026_v18  ;;  %v845_v63 = vpop.f32.mrf.mxu3 }
 0x2a5   :  { %v1035_v43 = vsel %vm1032_vm9, %v1034_v55, %v1030_v52  ;;  %v846_v51 = vadd.f32 %v845_v63, %v2429_v22 }
 0x2a6   :  { %v2460_v41 = vmul.f32 %v1672_v57, %v1035_v43 }
 0x2a7   :  { %v879_v15 = vpop.f32.mrf.mxu2 }
 0x2a8   :  { %v880_v24 = vadd.f32 %v879_v15, %v2425_v44 }
 0x2aa   :  { %v1524_v60 = vmul.f32 -1.442695, %v880_v24 }
 0x2ac   :  { %1673 = vpow2.f32 %v1524_v60 }
 0x2af   :  { %v882_v45 = vpop.f32.mrf.mxu2 }
 0x2b0   :  { %v883_v17 = vadd.f32 %v882_v45, %v2425_v44 }
 0x2b2   :  { %v1525_v13 = vmul.f32 -1.442695, %v883_v17  ;;  %v1674_v40 = vpop.eup %1673 }
 0x2b3   :  { %v2472_v29 = vadd.f32 1.0, %v1674_v40 }
 0x2b4   :  { %1675 = vpow2.f32 %v1525_v13  ;;  %v676_v48 = vpop.xlane.xlu0 %675 }
 0x2b5   :  { %1677 = vpow2.f32 %v1523_v28  ;;  %v677_v54 = vsub.f32 %v2418_v20, %v676_v48  ;;  %vm1087_vm3 = vweird.f32 %v2472_v29 }
 0x2b6   :  { %1679 = vpow2.f32 %v1522_v59 }
 0x2b7   :  { %v884_v58 = vpop.f32.mrf.mxu2  ;;  %1681 = vpow2.f32 %v1521_v21  ;;  %v678_v39 = vmul.f32 1.442695, %v677_v54 }
 0x2b8   :  { %v885_v61 = vadd.f32 %v884_v58, %v2425_v44  ;;  %1683 = vrcp.f32 %v2472_v29 }
 0x2ba   :  { %v1676_v62 = vpop.eup %1675  ;;  %v1526_v14 = vmul.f32 -1.442695, %v885_v61 }
 0x2bb   :  { %v1678_v2 = vpop.eup %1677  ;;  %v2477_v6 = vadd.f32 1.0, %v1676_v62 }
 0x2bc   :  { %1685 = vpow2.f32 %v1526_v14  ;;  %v1680_v12 = vpop.eup %1679  ;;  %v2480_v19 = vadd.f32 1.0, %v1678_v2  ;;  %v1093_v14 = vand.u32 2147483648, %v2472_v29  ;;  %v1091_v2 = vand.u32 2147483647, %v2472_v29 }
 0x2bd   :  { %1687 = vrcp.f32 %v2477_v6  ;;  %v1682_v44 = vpop.eup %1681  ;;  %v2482_v53 = vadd.f32 1.0, %v1680_v12  ;;  %vm1102_vm11 = vweird.f32 %v2477_v6  ;;  %v1108_v45 = vand.u32 2147483648, %v2477_v6 }
 0x2be   :  { %1689 = vpow2.f32 %v678_v39  ;;  %v2484_v20 = vpop.eup %1683  ;;  %v2494_v47 = vadd.f32 1.0, %v1682_v44  ;;  %v1106_v25 = vand.u32 2147483647, %v2477_v6  ;;  %v839_v12 = vadd.f32 %v2463_v42, %v2429_v22 }
 0x2bf   :  { %1691 = vrcp.f32 %v2480_v19  ;;  %v1083_v49 = vmul.f32 %v2484_v20, %v2472_v29  ;;  %vm1088_vm15 = vweird.f32 %v2484_v20  ;;  %v1109_v62 = vor.u32 1.1754944e-38, %v1108_v45 }
 0x2c0   :  { %1693 = vrcp.f32 %v2482_v53  ;;  %vm1107_vm2 = vcmp.eq.f32.partialorder %v1106_v25, 8.507059e+37  ;;  %vm2541_vm4 = vmor %vm1087_vm3, %vm1088_vm15  ;;  %vm1092_vm6 = vcmp.eq.f32.partialorder %v1091_v2, 8.507059e+37  ;;  %vm1072_vm7 = vweird.f32 %v2480_v19 }
 0x2c1   :  { %v1084_v27 = vsub.f32 1.0, %v1083_v49  ;;  %v1076_v63 = vand.u32 2147483647, %v2480_v19  ;;  %v836_v49 = vadd.f32 %v2456_v35, %v2429_v22  ;;  %v1063_v35 = vand.u32 2147483648, %v2482_v53 }
 0x2c2   :  { %v1686_v11 = vpop.eup %1685 }
 0x2c3   :  { %v2487_v46 = vpop.eup %1687  ;;  %v946_v36 = vadd.f32 1.0, %v1686_v11  ;;  %v1085_v43 = vmul.f32 %v2484_v20, %v1084_v27 }
 0x2c4   :  { %v2489_v7 = vpop.eup %1689  ;;  %v1098_v9 = vmul.f32 %v2487_v46, %v2477_v6 }
 0x2c5   :  { %1695 = vrcp.f32 %v946_v36  ;;  %v680_v56 = vsel %vm673_vm0, %v2489_v7, 0.0  ;;  %v2500_v30 = vpop.eup %1691  ;;  %v1123_v57 = vand.u32 2147483648, %v946_v36  ;;  %vm1103_vm0 = vweird.f32 %v2487_v46 }
 0x2c6   :  { %681 = vadd.xlane.f32.xlu1 %v680_v56  ;;  %v1099_v33 = vsub.f32 1.0, %v1098_v9  ;;  %1697 = vrcp.f32 %v2494_v47  ;;  %v2503_v34 = vpop.eup %1693  ;;  %v1068_v26 = vmul.f32 %v2500_v30, %v2480_v19  ;;  %v1121_v60 = vand.u32 2147483647, %v946_v36  ;;  %vm2521_vm13 = vmor %vm1102_vm11, %vm1103_vm0 }
 0x2c7   :  { %1699 = vtanh.f32 %v846_v51  ;;  %v1053_v52 = vmul.f32 %v2503_v34, %v2482_v53  ;;  %vm1117_vm12 = vweird.f32 %v946_v36  ;;  %v1124_v59 = vor.u32 1.1754944e-38, %v1123_v57 }
 0x2c8   :  { %v1100_v3 = vmul.f32 %v2487_v46, %v1099_v33  ;;  %v1069_v15 = vsub.f32 1.0, %v1068_v26  ;;  %1701 = vtanh.f32 %v844_v37  ;;  %vm1122_vm1 = vcmp.eq.f32.partialorder %v1121_v60, 8.507059e+37 }
 0x2c9   :  { %v1054_v40 = vsub.f32 1.0, %v1053_v52  ;;  %v1086_v61 = vadd.f32 %v2484_v20, %v1085_v43  ;;  %1703 = vtanh.f32 %v841_v5  ;;  %vm1073_vm5 = vweird.f32 %v2500_v30 }
 0x2ca   :  { %v1101_v31 = vadd.f32 %v2487_v46, %v1100_v3  ;;  %v1070_v1 = vmul.f32 %v2500_v30, %v1069_v15  ;;  %v1078_v9 = vand.u32 2147483648, %v2480_v19  ;;  %1705 = vtanh.f32 %v839_v12  ;;  %vm2556_vm8 = vmor %vm1072_vm7, %vm1073_vm5 }
 0x2cb   :  { %v1696_v50 = vpop.eup %1695  ;;  %v1055_v42 = vmul.f32 %v2503_v34, %v1054_v40  ;;  %vm1058_vm9 = vweird.f32 %v2503_v34  ;;  %vm1077_vm0 = vcmp.eq.f32.partialorder %v1076_v63, 8.507059e+37  ;;  %v1061_v3 = vand.u32 2147483647, %v2482_v53  ;;  %v1530_v63 = vld [vmem:[%s1293_s7 + $0x2] sm:$0x1] }
 0x2cc   :  { %v1113_v16 = vmul.f32 %v1696_v50, %v946_v36  ;;  %v2512_v55 = vpop.eup %1697  ;;  %vm1118_vm10 = vweird.f32 %v1696_v50  ;;  %v1105_v48 = vsel %vm2521_vm13, %v2487_v46, %v1101_v31  ;;  %v1090_v46 = vsel %vm2541_vm4, %v2484_v20, %v1086_v61 }
 0x2cd   :  { %v1038_v13 = vmul.f32 %v2512_v55, %v2494_v47  ;;  %vm1119_vm14 = vmor %vm1117_vm12, %vm1118_vm10  ;;  %v1700_v21 = vpop.eup %1699  ;;  %v1110_v8 = vsel %vm1107_vm2, %v1109_v62, %v1105_v48  ;;  %v1071_v29 = vadd.f32 %v2500_v30, %v1070_v1  ;;  %v1094_v36 = vor.u32 1.1754944e-38, %v1093_v14 }
 0x2ce   :  { %v1114_v18 = vsub.f32 1.0, %v1113_v16  ;;  %v1702_v6 = vpop.eup %1701  ;;  %v1079_v26 = vor.u32 1.1754944e-38, %v1078_v9  ;;  %vm1057_vm10 = vweird.f32 %v2482_v53  ;;  %v834_v37 = vadd.f32 %v2451_v38, %v2429_v22 }
 0x2cf   :  { %v1039_v11 = vsub.f32 1.0, %v1038_v13  ;;  %v1137_v56 = vmul.f32 %v1702_v6, %v1110_v8  ;;  %v1095_v20 = vsel %vm1092_vm6, %v1094_v36, %v1090_v46  ;;  %v1075_v51 = vsel %vm2556_vm8, %v2500_v30, %v1071_v29  ;;  %v1704_v27 = vpop.eup %1703  ;;  %vm1059_vm11 = vmor %vm1057_vm10, %vm1058_vm9  ;;  %v1246_v36 = vld [vmem:[%s2601_s4] sm:$0xc0] }
 0x2d0   :  { %v1115_v24 = vmul.f32 %v1696_v50, %v1114_v18  ;;  %v1136_v16 = vmul.f32 %v1704_v27, %v1095_v20  ;;  %1707 = vtanh.f32 %v836_v49  ;;  %v1080_v30 = vsel %vm1077_vm0, %v1079_v26, %v1075_v51  ;;  %v1706_v57 = vpop.eup %1705  ;;  %v1531_v20 = vld [vmem:[%s1295_s8 + $0x66] sm:$0x1]  ;;  %v1247_v26 = vld [vmem:[%s2601_s4 + $0x5] ss:$0 sm:$0xff] }
 0x2d1   :  { %v1040_v19 = vmul.f32 %v2512_v55, %v1039_v11  ;;  %vm1043_vm12 = vweird.f32 %v2512_v55  ;;  %v1064_v43 = vor.u32 1.1754944e-38, %v1063_v35  ;;  %v1048_v15 = vand.u32 2147483648, %v2494_v47 }
 0x2d2   :  { %v1116_v17 = vadd.f32 %v1696_v50, %v1115_v24  ;;  %v1135_v24 = vmul.f32 %v1706_v57, %v1080_v30  ;;  %vm1062_vm13 = vcmp.eq.f32.partialorder %v1061_v3, 8.507059e+37  ;;  %v1046_v22 = vand.u32 2147483647, %v2494_v47 }
 0x2d3   :  { %v1041_v52 = vadd.f32 %v2512_v55, %v1040_v19  ;;  %1709 = vtanh.f32 %v834_v37  ;;  %v1049_v60 = vor.u32 1.1754944e-38, %v1048_v15  ;;  %vm1221_vm6 = vcmask 523264  }
 0x2d4   :  { %v1120_v58 = vsel %vm1119_vm14, %v1696_v50, %v1116_v17  ;;  %v1056_v50 = vadd.f32 %v2503_v34, %v1055_v42  ;;  %vm1042_vm14 = vweird.f32 %v2494_v47  ;;  %v717_v47 = vld [vmem:[%s2601_s4 + $0x4] ss:$0 sm:$0xff]  ;;  %vm1159_vm7 = vcmask 778240  }
 0x2d5   :  { %v1125_v54 = vsel %vm1122_vm1, %v1124_v59, %v1120_v58  ;;  %vm1044_vm15 = vmor %vm1042_vm14, %vm1043_vm12  ;;  %vm1047_vm1 = vcmp.eq.f32.partialorder %v1046_v22, 8.507059e+37  ;;  %v1249_v9 = vrot.slane %v1246_v36, 6  ;;  %vm1271_vm12 = vcmask 8192  }
 0x2d6   :  { %v1138_v39 = vmul.f32 %v1700_v21, %v1125_v54  ;;  %v1060_v18 = vsel %vm1059_vm11, %v2503_v34, %v1056_v50  ;;  %v1045_v53 = vsel %vm1044_vm15, %v2512_v55, %v1041_v52  ;;  %v1708_v34 = vpop.eup %1707  ;;  %vm1184_vm11 = vcmask 785408  }
 0x2d7   :  { %v1065_v38 = vsel %vm1062_vm13, %v1064_v43, %v1060_v18  ;;  %v1050_v5 = vsel %vm1047_vm1, %v1049_v60, %v1045_v53 }
 0x2d8   :  { %1143 = vmatpush.xpose.msrb.mxu0 %v1138_v39  ;;  %v1134_v31 = vmul.f32 %v1708_v34, %v1065_v38 }
 0x2d9   :  { %v1710_v45 = vpop.eup %1709 }
 0x2da   :  { %v1133_v17 = vmul.f32 %v1710_v45, %v1050_v5 }
 0x2dc   :  { %1144 = vmatpush.xpose.msrb.mxu0 %v1137_v56  ;;  %v1212_v56 = vld [vmem:[%s1211_s30] sm:$0x1] }
 0x2dd   :  { %v1216_v49 = vadd.f32 %v1530_v63, %v1212_v56 }
 0x2df   :  { %v1220_v33 = vadd.f32 %v1531_v20, %v1216_v49 }
 0x2e0   :  { %1145 = vmatpush.xpose.msrb.mxu0 %v1136_v16 }
 0x2e4   :  { %1146 = vmatpush.xpose.msrb.mxu0 %v1135_v24 }
 0x2e8   :  { %1147 = vmatpush.xpose.msrb.mxu0 %v1134_v31 }
 0x2ec   :  { %1148 = vmatpush.xpose.msrb.mxu0 %v1133_v17 }
 0x2f0   :  { %1149 = vmatpush.xpose.msrb.mxu0 %v2460_v41 }
 0x2f4   :  { %1150 = vmatpush.xpose.msrb.mxu0 %v2458_v32 }
 0x2f8   :  { %1151 = vmatpush.xpose.msrb.mxu0 %v2453_v10 }
 0x2fc   :  { %1152 = vmatpush.xpose.msrb.mxu0 %v2448_v0 }
 0x300   :  { %1153 = vmatpush.xpose.msrb.mxu0 %v2441_v4 }
 0x304   :  { %1154 = vmatpush.xpose.msrb.mxu0 %v2437_v23 }
 0x307   :  { %1155 = vmatmul.f32.vlgmr.msrb.gmra.mxu0 %v717_v47 }
 0x308   :  { %1266 = vmatpush.xpose.msra.mxu0 %v1249_v9 }
 0x339   :  { %v682_v55 = vpop.xlane.xlu1 %681 }
 0x33a   :  { %1711 = vrcp.f32 %v682_v55  ;;  %v694_v13 = vand.u32 2147483648, %v682_v55  ;;  %v692_v10 = vand.u32 2147483647, %v682_v55  ;;  %vm688_vm3 = vweird.f32 %v682_v55 }
 0x33c   :  { %v695_v4 = vor.u32 1.1754944e-38, %v694_v13  ;;  %vm693_vm5 = vcmp.eq.f32.partialorder %v692_v10, 8.507059e+37 }
 0x340   :  { %v1712_v28 = vpop.eup %1711 }
 0x341   :  { %v684_v25 = vmul.f32 %v1712_v28, %v682_v55  ;;  %vm689_vm2 = vweird.f32 %v1712_v28 }
 0x342   :  { %vm690_vm4 = vmor %vm688_vm3, %vm689_vm2 }
 0x343   :  { %v685_v41 = vsub.f32 1.0, %v684_v25 }
 0x345   :  { %v686_v32 = vmul.f32 %v1712_v28, %v685_v41 }
 0x347   :  { %v687_v59 = vadd.f32 %v1712_v28, %v686_v32 }
 0x349   :  { %v691_v0 = vsel %vm690_vm4, %v1712_v28, %v687_v59 }
 0x34a   :  { %v696_v23 = vsel %vm693_vm5, %v695_v4, %v691_v0 }
 0x34b   :  { %v697_v1 = vmul.f32 %v2489_v7, %v696_v23 }
 0x34d   :  { %1532 = vmatmul.msk.f32.vlgmr.msra.gmra.mxu3 %vm1221_vm6, %v697_v1 }
 0x384   :  { %v1156_v40 = vpop.f32.mrf.mxu0 }
 0x385   :  { %v1160_v21 = vsel %vm1159_vm7, %v1156_v40, -inf }
 0x386   :  { %1161 = vmax.xlane.f32.xlu0 %v1160_v21 }
 0x3d0   :  { %v1242_v51 = vpop.f32.mrf.mxu3 }
 0x3f9   :  { %v1162_v58 = vpop.xlane.xlu0 %1161 }
 0x3fa   :  { %v1163_v48 = vsub.f32 %v1156_v40, %v1162_v58 }
 0x3fc   :  { %v1164_v61 = vmul.f32 1.442695, %v1163_v48 }
 0x3fe   :  { %1713 = vpow2.f32 %v1164_v61 }
 0x404   :  { %v1714_v54 = vpop.eup %1713 }
 0x405   :  { %v1166_v62 = vsel %vm1159_vm7, %v1714_v54, 0.0 }
 0x406   :  { %1167 = vadd.xlane.f32.xlu1 %v1166_v62 }
 0x479   :  { %v1168_v14 = vpop.xlane.xlu1 %1167 }
 0x47a   :  { %1715 = vrcp.f32 %v1168_v14  ;;  %v1180_v12 = vand.u32 2147483648, %v1168_v14  ;;  %v1178_v7 = vand.u32 2147483647, %v1168_v14  ;;  %vm1174_vm9 = vweird.f32 %v1168_v14 }
 0x47c   :  { %v1181_v11 = vor.u32 1.1754944e-38, %v1180_v12  ;;  %vm1179_vm10 = vcmp.eq.f32.partialorder %v1178_v7, 8.507059e+37 }
 0x480   :  { %v1716_v39 = vpop.eup %1715 }
 0x481   :  { %v1170_v2 = vmul.f32 %v1716_v39, %v1168_v14  ;;  %vm1175_vm8 = vweird.f32 %v1716_v39 }
 0x482   :  { %vm1176_vm0 = vmor %vm1174_vm9, %vm1175_vm8 }
 0x483   :  { %v1171_v6 = vsub.f32 1.0, %v1170_v2 }
 0x485   :  { %v1172_v8 = vmul.f32 %v1716_v39, %v1171_v6 }
 0x487   :  { %v1173_v44 = vadd.f32 %v1716_v39, %v1172_v8 }
 0x489   :  { %v1177_v46 = vsel %vm1176_vm0, %v1716_v39, %v1173_v44 }
 0x48a   :  { %v1182_v29 = vsel %vm1179_vm10, %v1181_v11, %v1177_v46 }
 0x48b   :  { %v1183_v42 = vmul.f32 %v1714_v54, %v1182_v29 }
 0x48d   :  { %1527 = vmatmul.msk.f32.vlgmr.msrb.gmra.mxu1 %vm1184_vm11, %v1183_v42 }
 0x50a   :  { %v1205_v50 = vpop.f32.mrf.mxu1 }
 0x50b   :  { %v1243_v19 = vadd.f32 %v1242_v51, %v1205_v50 }
 0x50d   :  { %v1245_v27 = vadd.f32 %v1243_v19, %v1220_v33 }
 0x50f   :  { %1267 = vmatmul.f32.vlgmr.msra.gmra.mxu0 %v1245_v27 }
 0x58c   :  { %v1268_v35 = vpop.f32.mrf.mxu0 }
 0x58d   :  { %v1269_v16 = vadd.f32 %v1268_v35, %v1247_v26 }
 0x58f   :  { %1272 = vst.msk [vmem:[#allocation9] sm:$0x1] %vm1271_vm12, %v1269_v16 }
 0x590   :  { %1283 = dma.vmem_to_hbm [thread:$0]  %s1279_s11, 16, %s1281_s2, [#allocation4]  }
 0x591   :  { %1807 = dma.done.wait [#allocation4], 16  }
 0x592   :  { %1808 = vsyncadd [#allocation4], 4294967280 }
 0x593   :  { %1288 = vsyncpa [#allocation3], 1 }
 0x594   :  { %1289 = vsyncpa [#allocation8], 1 }
 0x595   :  { %1290 = vsyncpa [#allocation4], 1 }
 0x596   :  { %1291 = vsyncpa [#allocation5], 1 }

</bundles_post_ra>
